<compile_context>
chip_gen: v7x
topology: tpu7x:2x2x1
jax: 0.10.0
libtpu: 0.0.40
codegen_flags: <defaults>
</compile_context>

<pallas_src>
import jax
import jax.numpy as jnp
import numpy as np
from jax.experimental import pallas as pl
from jax.experimental.pallas import tpu as pltpu

_DELTA_N = 2            # (win_length - 1) // 2 with win_length = 5
_DELTA_SCALE = 0.1      # 1 / (n * (n + 1) * (2n + 1) / 3) = 1 / 10


def _delta_frames(x):
    """torchaudio.functional.compute_deltas (win_length=5, replicate pad)
    along axis 1 (frames) of a (bt, T, F) VMEM tile.

    delta[:, t] = (-2 x[:, t-2] - x[:, t-1] + x[:, t+1] + 2 x[:, t+2]) / 10.
    """
    t = x.shape[1]
    first = x[:, 0:1, :]
    last = x[:, t - 1:t, :]
    xp = jnp.concatenate([first, first, x, last, last], axis=1)  # (bt, T+4, F)
    return (-2.0 * xp[:, 0:t, :] - xp[:, 1:t + 1, :]
            + xp[:, 3:t + 3, :] + 2.0 * xp[:, 4:t + 4, :]) * _DELTA_SCALE


def spectral_losses(x_mag, y_mag, *, vmem_budget_bytes=28 * 1024 * 1024):
    """Fused SpectralConvergenceLoss + LogSTFTMagnitudeLoss (Pallas TPU).

    Args:
      x_mag: (B, frames, freq) predicted magnitude spectrogram (any float dtype).
      y_mag: (B, frames, freq) groundtruth magnitude spectrogram.

    Returns:
      (sc_loss, mag_loss): two (B,) float32 arrays.
    """
    assert x_mag.shape == y_mag.shape and x_mag.ndim == 3
    b, t, f = x_mag.shape
    if y_mag.dtype != x_mag.dtype:
        y_mag = y_mag.astype(x_mag.dtype)
    in_bytes = jnp.dtype(x_mag.dtype).itemsize

    # Pack as many batch rows per grid step as a conservative VMEM budget
    # allows: 2 inputs x 2 pipeline buffers (native dtype) + ~10 live f32
    # (t, f) temporaries inside the kernel (conservative; the order-by-order
    # chain evaluation keeps the true peak lower).
    per_row_bytes = t * f * (2 * 2 * in_bytes + 10 * 4)
    bt = 1
    for cand in range(1, b + 1):
        if b % cand == 0 and cand * per_row_bytes <= vmem_budget_bytes:
            bt = cand

    inv_tf = 1.0 / float(t * f)

    def kernel(x_ref, y_ref, sc_ref, mag_ref):
        # Upcast on the VMEM tile only (inputs are DMA'd in native dtype).
        x = x_ref[...].astype(jnp.float32)   # (bt, t, f)
        y = y_ref[...].astype(jnp.float32)

        def frob2(v):                        # sum of squares -> (bt, 1, 1)
            return jnp.sum(jnp.sum(v * v, axis=2, keepdims=True),
                           axis=1, keepdims=True)

        def l1_mean(v):                      # mean(|v|) -> (bt, 1, 1)
            return jnp.sum(jnp.sum(jnp.abs(v), axis=2, keepdims=True),
                           axis=1, keepdims=True) * inv_tf

        def sc_term(num2, den2):
            return jnp.sqrt(num2) / jnp.maximum(jnp.sqrt(den2), 1e-5)

        diff = y - x                          # SC numerator chain (linearity)
        ldiff = jnp.log(y) - jnp.log(x)       # log-magnitude chain (linearity)

        # ---- order 0 -------------------------------------------------------
        sc = sc_term(frob2(diff), frob2(y))
        mag = l1_mean(ldiff)

        # ---- order 1 (delta) ----------------------------------------------
        # Evaluate order-by-order so the previous order's tensors die as soon
        # as their deltas are produced (keeps peak VMEM low).
        d_diff = _delta_frames(diff)
        d_y = _delta_frames(y)
        d_ldiff = _delta_frames(ldiff)
        sc += sc_term(frob2(d_diff), frob2(d_y))
        mag += l1_mean(d_ldiff)

        # ---- order 2 (delta-delta / acceleration) --------------------------
        dd_diff = _delta_frames(d_diff)
        dd_y = _delta_frames(d_y)
        dd_ldiff = _delta_frames(d_ldiff)
        sc += sc_term(frob2(dd_diff), frob2(dd_y))
        mag += l1_mean(dd_ldiff)

        sc_ref[...] = sc.astype(sc_ref.dtype)
        mag_ref[...] = mag.astype(mag_ref.dtype)

    # Advisory cost hint for the XLA scheduler (mem-bound, 2 logs / element).
    elems = b * t * f
    cost = pl.CostEstimate(flops=40 * elems, transcendentals=2 * elems,
                           bytes_accessed=2 * elems * in_bytes + 8 * b)

    sc, mag = pl.pallas_call(
        kernel,
        out_shape=(jax.ShapeDtypeStruct((b, 1, 1), jnp.float32),
                   jax.ShapeDtypeStruct((b, 1, 1), jnp.float32)),
        grid_spec=pltpu.PrefetchScalarGridSpec(
            num_scalar_prefetch=0,
            grid=(b // bt,),
            in_specs=[
                pl.BlockSpec((bt, t, f), lambda i: (i, 0, 0)),
                pl.BlockSpec((bt, t, f), lambda i: (i, 0, 0)),
            ],
            out_specs=[
                pl.BlockSpec((bt, 1, 1), lambda i: (i, 0, 0)),
                pl.BlockSpec((bt, 1, 1), lambda i: (i, 0, 0)),
            ]),
        compiler_params=pltpu.CompilerParams(
            dimension_semantics=("parallel",),
            vmem_limit_bytes=64 * 1024 * 1024),
        cost_estimate=cost,
    )(x_mag, y_mag)
    return sc.reshape(b), mag.reshape(b)


# ---------------------------------------------------------------------------
# STFT front-end (pure JAX / XLA, mirrors torch.stft + the module's magnitude).
# ---------------------------------------------------------------------------
def _hann_window(win_length):
    n = jnp.arange(win_length, dtype=jnp.float32)
    return 0.5 - 0.5 * jnp.cos(2.0 * jnp.pi * n / win_length)


def _stft_magnitude(x, fft_size, hop_size, win_length, window):
    """torch.stft(center=True, pad_mode='reflect') magnitude -> (B, frames, freq)."""
    pad = fft_size // 2
    xp = jnp.pad(x, ((0, 0), (pad, pad)), mode="reflect")
    lpad = (fft_size - win_length) // 2
    win = jnp.pad(window, (lpad, fft_size - win_length - lpad))
    n_frames = 1 + (xp.shape[1] - fft_size) // hop_size
    idx = (jnp.arange(n_frames)[:, None] * hop_size
           + jnp.arange(fft_size)[None, :])                    # (frames, fft)
    frames = xp[:, idx] * win                                   # (B, frames, fft)
    spec = jnp.fft.rfft(frames, n=fft_size, axis=-1)
    power = spec.real ** 2 + spec.imag ** 2
    return jnp.sqrt(jnp.maximum(power, 1e-5))                   # (B, frames, freq)


def stft_loss(x, y, *, fft_size=1024, shift_size=120, win_length=600,
              window="hann_window"):
    """Pallas-backed equivalent of STFTLoss.forward: returns (sc_loss, mag_loss)."""
    assert window == "hann_window", "only hann_window is supported"
    # TODO(synk): the STFT itself (framing + rFFT) has no Pallas TPU equivalent
    # (no FFT primitive); it runs as XLA ops, only the losses run in the kernel.
    win = _hann_window(win_length)
    x_mag = _stft_magnitude(x, fft_size, shift_size, win_length, win)
    y_mag = _stft_magnitude(y, fft_size, shift_size, win_length, win)
    return spectral_losses(x_mag, y_mag)


# ---------------------------------------------------------------------------
# Pure-JAX reference (mirrors the PyTorch/torchaudio module structure).
# ---------------------------------------------------------------------------
def _ref_delta(x):  # (B, T, F), delta along axis 1 with replicate pad
    t = x.shape[1]
    xp = jnp.pad(x, ((0, 0), (_DELTA_N, _DELTA_N), (0, 0)), mode="edge")
    return (-2.0 * xp[:, 0:t] - xp[:, 1:t + 1]
            + xp[:, 3:t + 3] + 2.0 * xp[:, 4:t + 4]) / 10.0


def _ref_losses(x_mag, y_mag):
    def frob(v):
        return jnp.sqrt(jnp.sum(v * v, axis=(1, 2)))

    def sc(num, den):
        return frob(num) / jnp.maximum(frob(den), 1e-5)

    def l1m(a, b):
        return jnp.mean(jnp.abs(a - b), axis=(1, 2))

    # Spectral convergence loss (same op order as the torch module).
    xd, yd = _ref_delta(x_mag), _ref_delta(y_mag)
    xa, ya = _ref_delta(xd), _ref_delta(yd)
    sc_loss = sc(y_mag - x_mag, y_mag) + sc(yd - xd, yd) + sc(ya - xa, ya)

    # Log STFT magnitude loss.
    lx, ly = jnp.log(x_mag), jnp.log(y_mag)
    lxd, lyd = _ref_delta(lx), _ref_delta(ly)
    lxa, lya = _ref_delta(lxd), _ref_delta(lyd)
    mag_loss = l1m(ly, lx) + l1m(lyd, lxd) + l1m(lya, lxa)
    return sc_loss, mag_loss


if __name__ == "__main__":
    key = jax.random.PRNGKey(0)
    kx, ky = jax.random.split(key)

    B, T_SIG = 2, 1024
    FFT, HOP, WIN = 128, 32, 64      # scaled-down STFT config (small shapes)

    x = jax.random.normal(kx, (B, T_SIG), dtype=jnp.float32)
    y = jax.random.normal(ky, (B, T_SIG), dtype=jnp.float32)

    sc_loss, mag_loss = stft_loss(x, y, fft_size=FFT, shift_size=HOP,
                                  win_length=WIN)
    sc_loss, mag_loss = jax.block_until_ready((sc_loss, mag_loss))

    # Reference check on the same magnitude spectrograms.
    win = _hann_window(WIN)
    x_mag = _stft_magnitude(x, FFT, HOP, WIN, win)
    y_mag = _stft_magnitude(y, FFT, HOP, WIN, win)
    sc_ref, mag_ref = _ref_losses(x_mag, y_mag)

    assert sc_loss.shape == (B,) and mag_loss.shape == (B,)
    assert np.allclose(np.asarray(sc_loss), np.asarray(sc_ref),
                       rtol=1e-4, atol=1e-4), (sc_loss, sc_ref)
    assert np.allclose(np.asarray(mag_loss), np.asarray(mag_ref),
                       rtol=1e-4, atol=1e-4), (mag_loss, mag_ref)
    print("KERNEL_OK")
</pallas_src>

<mosaic_0001>
module attributes {stable_mosaic.version = 11 : i64} {
  func.func @kernel(%arg0: i32, %arg1: memref<2x33x65xf32, #tpu.memory_space<vmem>>, %arg2: memref<2x33x65xf32, #tpu.memory_space<vmem>>, %arg3: memref<2x1x1xf32, #tpu.memory_space<vmem>>, %arg4: memref<2x1x1xf32, #tpu.memory_space<vmem>>) attributes {dimension_semantics = [#tpu.dimension_semantics<parallel>], iteration_bounds = array<i64: 1>, scalar_prefetch = 0 : i64, scratch_operands = 0 : i64, tpu.core_type = #tpu.core_type<tc>, window_params = [{transform_indices = @transform_0, window_bounds = array<i64: 2, 33, 65>}, {transform_indices = @transform_1, window_bounds = array<i64: 2, 33, 65>}, {transform_indices = @transform_2, window_bounds = array<i64: 2, 1, 1>}, {transform_indices = @transform_3, window_bounds = array<i64: 2, 1, 1>}]} {
    %c0 = arith.constant 0 : index
    %c0_0 = arith.constant 0 : index
    %c0_1 = arith.constant 0 : index
    %0 = vector.load %arg1[%c0, %c0_0, %c0_1] : memref<2x33x65xf32, #tpu.memory_space<vmem>>, vector<2x33x65xf32>
    %c0_2 = arith.constant 0 : index
    %c0_3 = arith.constant 0 : index
    %c0_4 = arith.constant 0 : index
    %1 = vector.load %arg2[%c0_2, %c0_3, %c0_4] : memref<2x33x65xf32, #tpu.memory_space<vmem>>, vector<2x33x65xf32>
    %2 = arith.subf %1, %0 : vector<2x33x65xf32>
    %3 = math.log %1 : vector<2x33x65xf32>
    %4 = math.log %0 : vector<2x33x65xf32>
    %5 = arith.subf %3, %4 : vector<2x33x65xf32>
    %6 = arith.mulf %2, %2 : vector<2x33x65xf32>
    %cst = arith.constant dense<0.000000e+00> : vector<2x33xf32>
    %7 = vector.multi_reduction <add>, %6, %cst [2] : vector<2x33x65xf32> to vector<2x33xf32>
    %8 = vector.shape_cast %7 : vector<2x33xf32> to vector<2x33x1xf32>
    %cst_5 = arith.constant dense<0.000000e+00> : vector<2x1xf32>
    %9 = vector.multi_reduction <add>, %8, %cst_5 [1] : vector<2x33x1xf32> to vector<2x1xf32>
    %10 = vector.shape_cast %9 : vector<2x1xf32> to vector<2x1x1xf32>
    %11 = arith.mulf %1, %1 : vector<2x33x65xf32>
    %cst_6 = arith.constant dense<0.000000e+00> : vector<2x33xf32>
    %12 = vector.multi_reduction <add>, %11, %cst_6 [2] : vector<2x33x65xf32> to vector<2x33xf32>
    %13 = vector.shape_cast %12 : vector<2x33xf32> to vector<2x33x1xf32>
    %cst_7 = arith.constant dense<0.000000e+00> : vector<2x1xf32>
    %14 = vector.multi_reduction <add>, %13, %cst_7 [1] : vector<2x33x1xf32> to vector<2x1xf32>
    %15 = vector.shape_cast %14 : vector<2x1xf32> to vector<2x1x1xf32>
    %16 = math.sqrt %10 : vector<2x1x1xf32>
    %17 = math.sqrt %15 : vector<2x1x1xf32>
    %cst_8 = arith.constant 9.99999974E-6 : f32
    %18 = vector.broadcast %cst_8 : f32 to vector<2x1x1xf32>
    %19 = arith.maximumf %17, %18 : vector<2x1x1xf32>
    %20 = arith.divf %16, %19 : vector<2x1x1xf32>
    %21 = math.absf %5 : vector<2x33x65xf32>
    %cst_9 = arith.constant dense<0.000000e+00> : vector<2x33xf32>
    %22 = vector.multi_reduction <add>, %21, %cst_9 [2] : vector<2x33x65xf32> to vector<2x33xf32>
    %23 = vector.shape_cast %22 : vector<2x33xf32> to vector<2x33x1xf32>
    %cst_10 = arith.constant dense<0.000000e+00> : vector<2x1xf32>
    %24 = vector.multi_reduction <add>, %23, %cst_10 [1] : vector<2x33x1xf32> to vector<2x1xf32>
    %25 = vector.shape_cast %24 : vector<2x1xf32> to vector<2x1x1xf32>
    %cst_11 = arith.constant 4.66200465E-4 : f32
    %26 = vector.broadcast %cst_11 : f32 to vector<2x1x1xf32>
    %27 = arith.mulf %25, %26 : vector<2x1x1xf32>
    %28 = vector.extract_strided_slice %2 {offsets = [0, 0, 0], sizes = [2, 1, 65], strides = [1, 1, 1]} : vector<2x33x65xf32> to vector<2x1x65xf32>
    %29 = vector.extract_strided_slice %2 {offsets = [0, 32, 0], sizes = [2, 1, 65], strides = [1, 1, 1]} : vector<2x33x65xf32> to vector<2x1x65xf32>
    %30 = tpu.concatenate %28, %28, %2, %29, %29 in 1 : vector<2x1x65xf32>, vector<2x1x65xf32>, vector<2x33x65xf32>, vector<2x1x65xf32>, vector<2x1x65xf32> -> vector<2x37x65xf32>
    %31 = vector.extract_strided_slice %30 {offsets = [0, 0, 0], sizes = [2, 33, 65], strides = [1, 1, 1]} : vector<2x37x65xf32> to vector<2x33x65xf32>
    %cst_12 = arith.constant -2.000000e+00 : f32
    %32 = vector.broadcast %cst_12 : f32 to vector<2x33x65xf32>
    %33 = arith.mulf %32, %31 : vector<2x33x65xf32>
    %34 = vector.extract_strided_slice %30 {offsets = [0, 1, 0], sizes = [2, 33, 65], strides = [1, 1, 1]} : vector<2x37x65xf32> to vector<2x33x65xf32>
    %35 = arith.subf %33, %34 : vector<2x33x65xf32>
    %36 = vector.extract_strided_slice %30 {offsets = [0, 3, 0], sizes = [2, 33, 65], strides = [1, 1, 1]} : vector<2x37x65xf32> to vector<2x33x65xf32>
    %37 = arith.addf %35, %36 : vector<2x33x65xf32>
    %38 = vector.extract_strided_slice %30 {offsets = [0, 4, 0], sizes = [2, 33, 65], strides = [1, 1, 1]} : vector<2x37x65xf32> to vector<2x33x65xf32>
    %cst_13 = arith.constant 2.000000e+00 : f32
    %39 = vector.broadcast %cst_13 : f32 to vector<2x33x65xf32>
    %40 = arith.mulf %39, %38 : vector<2x33x65xf32>
    %41 = arith.addf %37, %40 : vector<2x33x65xf32>
    %cst_14 = arith.constant 1.000000e-01 : f32
    %42 = vector.broadcast %cst_14 : f32 to vector<2x33x65xf32>
    %43 = arith.mulf %41, %42 : vector<2x33x65xf32>
    %44 = vector.extract_strided_slice %1 {offsets = [0, 0, 0], sizes = [2, 1, 65], strides = [1, 1, 1]} : vector<2x33x65xf32> to vector<2x1x65xf32>
    %45 = vector.extract_strided_slice %1 {offsets = [0, 32, 0], sizes = [2, 1, 65], strides = [1, 1, 1]} : vector<2x33x65xf32> to vector<2x1x65xf32>
    %46 = tpu.concatenate %44, %44, %1, %45, %45 in 1 : vector<2x1x65xf32>, vector<2x1x65xf32>, vector<2x33x65xf32>, vector<2x1x65xf32>, vector<2x1x65xf32> -> vector<2x37x65xf32>
    %47 = vector.extract_strided_slice %46 {offsets = [0, 0, 0], sizes = [2, 33, 65], strides = [1, 1, 1]} : vector<2x37x65xf32> to vector<2x33x65xf32>
    %cst_15 = arith.constant -2.000000e+00 : f32
    %48 = vector.broadcast %cst_15 : f32 to vector<2x33x65xf32>
    %49 = arith.mulf %48, %47 : vector<2x33x65xf32>
    %50 = vector.extract_strided_slice %46 {offsets = [0, 1, 0], sizes = [2, 33, 65], strides = [1, 1, 1]} : vector<2x37x65xf32> to vector<2x33x65xf32>
    %51 = arith.subf %49, %50 : vector<2x33x65xf32>
    %52 = vector.extract_strided_slice %46 {offsets = [0, 3, 0], sizes = [2, 33, 65], strides = [1, 1, 1]} : vector<2x37x65xf32> to vector<2x33x65xf32>
    %53 = arith.addf %51, %52 : vector<2x33x65xf32>
    %54 = vector.extract_strided_slice %46 {offsets = [0, 4, 0], sizes = [2, 33, 65], strides = [1, 1, 1]} : vector<2x37x65xf32> to vector<2x33x65xf32>
    %cst_16 = arith.constant 2.000000e+00 : f32
    %55 = vector.broadcast %cst_16 : f32 to vector<2x33x65xf32>
    %56 = arith.mulf %55, %54 : vector<2x33x65xf32>
    %57 = arith.addf %53, %56 : vector<2x33x65xf32>
    %cst_17 = arith.constant 1.000000e-01 : f32
    %58 = vector.broadcast %cst_17 : f32 to vector<2x33x65xf32>
    %59 = arith.mulf %57, %58 : vector<2x33x65xf32>
    %60 = vector.extract_strided_slice %5 {offsets = [0, 0, 0], sizes = [2, 1, 65], strides = [1, 1, 1]} : vector<2x33x65xf32> to vector<2x1x65xf32>
    %61 = vector.extract_strided_slice %5 {offsets = [0, 32, 0], sizes = [2, 1, 65], strides = [1, 1, 1]} : vector<2x33x65xf32> to vector<2x1x65xf32>
    %62 = tpu.concatenate %60, %60, %5, %61, %61 in 1 : vector<2x1x65xf32>, vector<2x1x65xf32>, vector<2x33x65xf32>, vector<2x1x65xf32>, vector<2x1x65xf32> -> vector<2x37x65xf32>
    %63 = vector.extract_strided_slice %62 {offsets = [0, 0, 0], sizes = [2, 33, 65], strides = [1, 1, 1]} : vector<2x37x65xf32> to vector<2x33x65xf32>
    %cst_18 = arith.constant -2.000000e+00 : f32
    %64 = vector.broadcast %cst_18 : f32 to vector<2x33x65xf32>
    %65 = arith.mulf %64, %63 : vector<2x33x65xf32>
    %66 = vector.extract_strided_slice %62 {offsets = [0, 1, 0], sizes = [2, 33, 65], strides = [1, 1, 1]} : vector<2x37x65xf32> to vector<2x33x65xf32>
    %67 = arith.subf %65, %66 : vector<2x33x65xf32>
    %68 = vector.extract_strided_slice %62 {offsets = [0, 3, 0], sizes = [2, 33, 65], strides = [1, 1, 1]} : vector<2x37x65xf32> to vector<2x33x65xf32>
    %69 = arith.addf %67, %68 : vector<2x33x65xf32>
    %70 = vector.extract_strided_slice %62 {offsets = [0, 4, 0], sizes = [2, 33, 65], strides = [1, 1, 1]} : vector<2x37x65xf32> to vector<2x33x65xf32>
    %cst_19 = arith.constant 2.000000e+00 : f32
    %71 = vector.broadcast %cst_19 : f32 to vector<2x33x65xf32>
    %72 = arith.mulf %71, %70 : vector<2x33x65xf32>
    %73 = arith.addf %69, %72 : vector<2x33x65xf32>
    %cst_20 = arith.constant 1.000000e-01 : f32
    %74 = vector.broadcast %cst_20 : f32 to vector<2x33x65xf32>
    %75 = arith.mulf %73, %74 : vector<2x33x65xf32>
    %76 = arith.mulf %43, %43 : vector<2x33x65xf32>
    %cst_21 = arith.constant dense<0.000000e+00> : vector<2x33xf32>
    %77 = vector.multi_reduction <add>, %76, %cst_21 [2] : vector<2x33x65xf32> to vector<2x33xf32>
    %78 = vector.shape_cast %77 : vector<2x33xf32> to vector<2x33x1xf32>
    %cst_22 = arith.constant dense<0.000000e+00> : vector<2x1xf32>
    %79 = vector.multi_reduction <add>, %78, %cst_22 [1] : vector<2x33x1xf32> to vector<2x1xf32>
    %80 = vector.shape_cast %79 : vector<2x1xf32> to vector<2x1x1xf32>
    %81 = arith.mulf %59, %59 : vector<2x33x65xf32>
    %cst_23 = arith.constant dense<0.000000e+00> : vector<2x33xf32>
    %82 = vector.multi_reduction <add>, %81, %cst_23 [2] : vector<2x33x65xf32> to vector<2x33xf32>
    %83 = vector.shape_cast %82 : vector<2x33xf32> to vector<2x33x1xf32>
    %cst_24 = arith.constant dense<0.000000e+00> : vector<2x1xf32>
    %84 = vector.multi_reduction <add>, %83, %cst_24 [1] : vector<2x33x1xf32> to vector<2x1xf32>
    %85 = vector.shape_cast %84 : vector<2x1xf32> to vector<2x1x1xf32>
    %86 = math.sqrt %80 : vector<2x1x1xf32>
    %87 = math.sqrt %85 : vector<2x1x1xf32>
    %cst_25 = arith.constant 9.99999974E-6 : f32
    %88 = vector.broadcast %cst_25 : f32 to vector<2x1x1xf32>
    %89 = arith.maximumf %87, %88 : vector<2x1x1xf32>
    %90 = arith.divf %86, %89 : vector<2x1x1xf32>
    %91 = arith.addf %20, %90 : vector<2x1x1xf32>
    %92 = math.absf %75 : vector<2x33x65xf32>
    %cst_26 = arith.constant dense<0.000000e+00> : vector<2x33xf32>
    %93 = vector.multi_reduction <add>, %92, %cst_26 [2] : vector<2x33x65xf32> to vector<2x33xf32>
    %94 = vector.shape_cast %93 : vector<2x33xf32> to vector<2x33x1xf32>
    %cst_27 = arith.constant dense<0.000000e+00> : vector<2x1xf32>
    %95 = vector.multi_reduction <add>, %94, %cst_27 [1] : vector<2x33x1xf32> to vector<2x1xf32>
    %96 = vector.shape_cast %95 : vector<2x1xf32> to vector<2x1x1xf32>
    %cst_28 = arith.constant 4.66200465E-4 : f32
    %97 = vector.broadcast %cst_28 : f32 to vector<2x1x1xf32>
    %98 = arith.mulf %96, %97 : vector<2x1x1xf32>
    %99 = arith.addf %27, %98 : vector<2x1x1xf32>
    %100 = vector.extract_strided_slice %43 {offsets = [0, 0, 0], sizes = [2, 1, 65], strides = [1, 1, 1]} : vector<2x33x65xf32> to vector<2x1x65xf32>
    %101 = vector.extract_strided_slice %43 {offsets = [0, 32, 0], sizes = [2, 1, 65], strides = [1, 1, 1]} : vector<2x33x65xf32> to vector<2x1x65xf32>
    %102 = tpu.concatenate %100, %100, %43, %101, %101 in 1 : vector<2x1x65xf32>, vector<2x1x65xf32>, vector<2x33x65xf32>, vector<2x1x65xf32>, vector<2x1x65xf32> -> vector<2x37x65xf32>
    %103 = vector.extract_strided_slice %102 {offsets = [0, 0, 0], sizes = [2, 33, 65], strides = [1, 1, 1]} : vector<2x37x65xf32> to vector<2x33x65xf32>
    %cst_29 = arith.constant -2.000000e+00 : f32
    %104 = vector.broadcast %cst_29 : f32 to vector<2x33x65xf32>
    %105 = arith.mulf %104, %103 : vector<2x33x65xf32>
    %106 = vector.extract_strided_slice %102 {offsets = [0, 1, 0], sizes = [2, 33, 65], strides = [1, 1, 1]} : vector<2x37x65xf32> to vector<2x33x65xf32>
    %107 = arith.subf %105, %106 : vector<2x33x65xf32>
    %108 = vector.extract_strided_slice %102 {offsets = [0, 3, 0], sizes = [2, 33, 65], strides = [1, 1, 1]} : vector<2x37x65xf32> to vector<2x33x65xf32>
    %109 = arith.addf %107, %108 : vector<2x33x65xf32>
    %110 = vector.extract_strided_slice %102 {offsets = [0, 4, 0], sizes = [2, 33, 65], strides = [1, 1, 1]} : vector<2x37x65xf32> to vector<2x33x65xf32>
    %cst_30 = arith.constant 2.000000e+00 : f32
    %111 = vector.broadcast %cst_30 : f32 to vector<2x33x65xf32>
    %112 = arith.mulf %111, %110 : vector<2x33x65xf32>
    %113 = arith.addf %109, %112 : vector<2x33x65xf32>
    %cst_31 = arith.constant 1.000000e-01 : f32
    %114 = vector.broadcast %cst_31 : f32 to vector<2x33x65xf32>
    %115 = arith.mulf %113, %114 : vector<2x33x65xf32>
    %116 = vector.extract_strided_slice %59 {offsets = [0, 0, 0], sizes = [2, 1, 65], strides = [1, 1, 1]} : vector<2x33x65xf32> to vector<2x1x65xf32>
    %117 = vector.extract_strided_slice %59 {offsets = [0, 32, 0], sizes = [2, 1, 65], strides = [1, 1, 1]} : vector<2x33x65xf32> to vector<2x1x65xf32>
    %118 = tpu.concatenate %116, %116, %59, %117, %117 in 1 : vector<2x1x65xf32>, vector<2x1x65xf32>, vector<2x33x65xf32>, vector<2x1x65xf32>, vector<2x1x65xf32> -> vector<2x37x65xf32>
    %119 = vector.extract_strided_slice %118 {offsets = [0, 0, 0], sizes = [2, 33, 65], strides = [1, 1, 1]} : vector<2x37x65xf32> to vector<2x33x65xf32>
    %cst_32 = arith.constant -2.000000e+00 : f32
    %120 = vector.broadcast %cst_32 : f32 to vector<2x33x65xf32>
    %121 = arith.mulf %120, %119 : vector<2x33x65xf32>
    %122 = vector.extract_strided_slice %118 {offsets = [0, 1, 0], sizes = [2, 33, 65], strides = [1, 1, 1]} : vector<2x37x65xf32> to vector<2x33x65xf32>
    %123 = arith.subf %121, %122 : vector<2x33x65xf32>
    %124 = vector.extract_strided_slice %118 {offsets = [0, 3, 0], sizes = [2, 33, 65], strides = [1, 1, 1]} : vector<2x37x65xf32> to vector<2x33x65xf32>
    %125 = arith.addf %123, %124 : vector<2x33x65xf32>
    %126 = vector.extract_strided_slice %118 {offsets = [0, 4, 0], sizes = [2, 33, 65], strides = [1, 1, 1]} : vector<2x37x65xf32> to vector<2x33x65xf32>
    %cst_33 = arith.constant 2.000000e+00 : f32
    %127 = vector.broadcast %cst_33 : f32 to vector<2x33x65xf32>
    %128 = arith.mulf %127, %126 : vector<2x33x65xf32>
    %129 = arith.addf %125, %128 : vector<2x33x65xf32>
    %cst_34 = arith.constant 1.000000e-01 : f32
    %130 = vector.broadcast %cst_34 : f32 to vector<2x33x65xf32>
    %131 = arith.mulf %129, %130 : vector<2x33x65xf32>
    %132 = vector.extract_strided_slice %75 {offsets = [0, 0, 0], sizes = [2, 1, 65], strides = [1, 1, 1]} : vector<2x33x65xf32> to vector<2x1x65xf32>
    %133 = vector.extract_strided_slice %75 {offsets = [0, 32, 0], sizes = [2, 1, 65], strides = [1, 1, 1]} : vector<2x33x65xf32> to vector<2x1x65xf32>
    %134 = tpu.concatenate %132, %132, %75, %133, %133 in 1 : vector<2x1x65xf32>, vector<2x1x65xf32>, vector<2x33x65xf32>, vector<2x1x65xf32>, vector<2x1x65xf32> -> vector<2x37x65xf32>
    %135 = vector.extract_strided_slice %134 {offsets = [0, 0, 0], sizes = [2, 33, 65], strides = [1, 1, 1]} : vector<2x37x65xf32> to vector<2x33x65xf32>
    %cst_35 = arith.constant -2.000000e+00 : f32
    %136 = vector.broadcast %cst_35 : f32 to vector<2x33x65xf32>
    %137 = arith.mulf %136, %135 : vector<2x33x65xf32>
    %138 = vector.extract_strided_slice %134 {offsets = [0, 1, 0], sizes = [2, 33, 65], strides = [1, 1, 1]} : vector<2x37x65xf32> to vector<2x33x65xf32>
    %139 = arith.subf %137, %138 : vector<2x33x65xf32>
    %140 = vector.extract_strided_slice %134 {offsets = [0, 3, 0], sizes = [2, 33, 65], strides = [1, 1, 1]} : vector<2x37x65xf32> to vector<2x33x65xf32>
    %141 = arith.addf %139, %140 : vector<2x33x65xf32>
    %142 = vector.extract_strided_slice %134 {offsets = [0, 4, 0], sizes = [2, 33, 65], strides = [1, 1, 1]} : vector<2x37x65xf32> to vector<2x33x65xf32>
    %cst_36 = arith.constant 2.000000e+00 : f32
    %143 = vector.broadcast %cst_36 : f32 to vector<2x33x65xf32>
    %144 = arith.mulf %143, %142 : vector<2x33x65xf32>
    %145 = arith.addf %141, %144 : vector<2x33x65xf32>
    %cst_37 = arith.constant 1.000000e-01 : f32
    %146 = vector.broadcast %cst_37 : f32 to vector<2x33x65xf32>
    %147 = arith.mulf %145, %146 : vector<2x33x65xf32>
    %148 = arith.mulf %115, %115 : vector<2x33x65xf32>
    %cst_38 = arith.constant dense<0.000000e+00> : vector<2x33xf32>
    %149 = vector.multi_reduction <add>, %148, %cst_38 [2] : vector<2x33x65xf32> to vector<2x33xf32>
    %150 = vector.shape_cast %149 : vector<2x33xf32> to vector<2x33x1xf32>
    %cst_39 = arith.constant dense<0.000000e+00> : vector<2x1xf32>
    %151 = vector.multi_reduction <add>, %150, %cst_39 [1] : vector<2x33x1xf32> to vector<2x1xf32>
    %152 = vector.shape_cast %151 : vector<2x1xf32> to vector<2x1x1xf32>
    %153 = arith.mulf %131, %131 : vector<2x33x65xf32>
    %cst_40 = arith.constant dense<0.000000e+00> : vector<2x33xf32>
    %154 = vector.multi_reduction <add>, %153, %cst_40 [2] : vector<2x33x65xf32> to vector<2x33xf32>
    %155 = vector.shape_cast %154 : vector<2x33xf32> to vector<2x33x1xf32>
    %cst_41 = arith.constant dense<0.000000e+00> : vector<2x1xf32>
    %156 = vector.multi_reduction <add>, %155, %cst_41 [1] : vector<2x33x1xf32> to vector<2x1xf32>
    %157 = vector.shape_cast %156 : vector<2x1xf32> to vector<2x1x1xf32>
    %158 = math.sqrt %152 : vector<2x1x1xf32>
    %159 = math.sqrt %157 : vector<2x1x1xf32>
    %cst_42 = arith.constant 9.99999974E-6 : f32
    %160 = vector.broadcast %cst_42 : f32 to vector<2x1x1xf32>
    %161 = arith.maximumf %159, %160 : vector<2x1x1xf32>
    %162 = arith.divf %158, %161 : vector<2x1x1xf32>
    %163 = arith.addf %91, %162 : vector<2x1x1xf32>
    %164 = math.absf %147 : vector<2x33x65xf32>
    %cst_43 = arith.constant dense<0.000000e+00> : vector<2x33xf32>
    %165 = vector.multi_reduction <add>, %164, %cst_43 [2] : vector<2x33x65xf32> to vector<2x33xf32>
    %166 = vector.shape_cast %165 : vector<2x33xf32> to vector<2x33x1xf32>
    %cst_44 = arith.constant dense<0.000000e+00> : vector<2x1xf32>
    %167 = vector.multi_reduction <add>, %166, %cst_44 [1] : vector<2x33x1xf32> to vector<2x1xf32>
    %168 = vector.shape_cast %167 : vector<2x1xf32> to vector<2x1x1xf32>
    %cst_45 = arith.constant 4.66200465E-4 : f32
    %169 = vector.broadcast %cst_45 : f32 to vector<2x1x1xf32>
    %170 = arith.mulf %168, %169 : vector<2x1x1xf32>
    %171 = arith.addf %99, %170 : vector<2x1x1xf32>
    %c0_46 = arith.constant 0 : index
    %c0_47 = arith.constant 0 : index
    %c0_48 = arith.constant 0 : index
    %172 = vector.load %arg3[%c0_46, %c0_47, %c0_48] : memref<2x1x1xf32, #tpu.memory_space<vmem>>, vector<2x1x1xf32>
    tpu.vector_store %arg3[%c0_46, %c0_47, %c0_48], %163 {strides = array<i32>} : memref<2x1x1xf32, #tpu.memory_space<vmem>>, vector<2x1x1xf32>,
    %c0_49 = arith.constant 0 : index
    %c0_50 = arith.constant 0 : index
    %c0_51 = arith.constant 0 : index
    %173 = vector.load %arg4[%c0_49, %c0_50, %c0_51] : memref<2x1x1xf32, #tpu.memory_space<vmem>>, vector<2x1x1xf32>
    tpu.vector_store %arg4[%c0_49, %c0_50, %c0_51], %171 {strides = array<i32>} : memref<2x1x1xf32, #tpu.memory_space<vmem>>, vector<2x1x1xf32>,
    return
  }
  func.func @transform_0(%arg0: i32) -> (i32, i32, i32) {
    %c0_i32 = arith.constant 0 : i32
    %c0_i32_0 = arith.constant 0 : i32
    %c0_i32_1 = arith.constant 0 : i32
    return %arg0, %c0_i32, %c0_i32_0 : i32, i32, i32
  }
  func.func @transform_1(%arg0: i32) -> (i32, i32, i32) {
    %c0_i32 = arith.constant 0 : i32
    %c0_i32_0 = arith.constant 0 : i32
    %c0_i32_1 = arith.constant 0 : i32
    return %arg0, %c0_i32, %c0_i32_0 : i32, i32, i32
  }
  func.func @transform_2(%arg0: i32) -> (i32, i32, i32) {
    %c0_i32 = arith.constant 0 : i32
    %c0_i32_0 = arith.constant 0 : i32
    %c0_i32_1 = arith.constant 0 : i32
    return %arg0, %c0_i32, %c0_i32_0 : i32, i32, i32
  }
  func.func @transform_3(%arg0: i32) -> (i32, i32, i32) {
    %c0_i32 = arith.constant 0 : i32
    %c0_i32_0 = arith.constant 0 : i32
    %c0_i32_1 = arith.constant 0 : i32
    return %arg0, %c0_i32, %c0_i32_0 : i32, i32, i32
  }
}

</mosaic_0001>

<bundles_post_ra>
// kernel: tpu_custom_call.1
= control target key start
LH: loop header
LB: loop body
LE: loop exit
PB: predicated region body
PF: predicated region fallthrough
CT: control target
= control target key end

     0   :  { %9 = vsyncpa [#allocation3], 0  ;;  %s3929_s0 = inlined_call_operand.hbm [shape: f32[2,33,65], index: 0, kind: input, shape index: {}]   ;;  %s3930_s1 = inlined_call_operand.hbm [shape: f32[2,33,65], index: 1, kind: input, shape index: {}]   ;;  %s3931_s2 = inlined_call_operand.hbm [shape: f32[2,1,1], index: 2, kind: output, shape index: {0}]   ;;  %s3932_s3 = inlined_call_operand.hbm [shape: f32[2,1,1], index: 3, kind: output, shape index: {1}]  }
   0x1   :  { %10 = vsyncpa [#allocation6], 0 }
   0x2   :  { %11 = vsyncpa [#allocation4], 0 }
   0x3   :  { %12 = vsyncpa [#allocation9], 0  ;;  %s2321_s12 = smov [#allocation2]   ;;  %s2225_s16 = scalar_lea.hbm %s3929_s0, 1280 }
   0x4   :  { %s18_s13 = sshll.u32 %s2321_s12, 4  ;;  %p2226_p0 = scmp.ne.s32.totalorder %s3929_s0, %s2225_s16  ;;  %s19_s13 = int_to_ptr.vmem [resolvable:$true] %s18_s13 }
   0x5   :  { %p2229_p1 = scmp.lt.u32.totalorder %s2225_s16, %s3929_s0 }
   0x7   :  { %p2231_p2 = pnand %p2229_p1, %p2226_p0 }
   0x9   :  { %2234 = shalt.err (!%p2231_p2)
}
   0xa   :  { %s2235_s21 = scalar_lea.vmem %s19_s13, 1280  ;;  %p2240_p4 = scmp.lt.s32.totalorder %s19_s13, %s19_s13 }
   0xb   :  { %p2236_p3 = scmp.ne.s32.totalorder %s19_s13, %s2235_s21  ;;  %p2241_p5 = scmp.lt.s32.totalorder %s2235_s21, %s2235_s21 }
   0xd   :  { %p2242_p6 = por %p2241_p5, %p2240_p4 }
   0xf   :  { %p2243_p7 = pnand %p2242_p6, %p2236_p3 }
  0x11   :  { %2246 = shalt.err (!%p2243_p7)
}
  0x12   :  { %s2322_s22 = smov 128   ;;  %s2323_s23 = smov 8  }
  0x13   :  { %24 = dma.hbm_to_vmem [thread:$0]  %s3929_s0, 1280, %s19_s13, [#allocation3], %s2322_s22, %s2322_s22, %s2323_s23  }
  0x14   :  { %s2324_s26 = smov [#allocation5]   ;;  %s2247_s30 = scalar_lea.hbm %s3930_s1, 1280 }
  0x15   :  { %s30_s27 = sshll.u32 %s2324_s26, 4  ;;  %p2248_p8 = scmp.ne.s32.totalorder %s3930_s1, %s2247_s30  ;;  %s31_s27 = int_to_ptr.vmem [resolvable:$true] %s30_s27 }
  0x16   :  { %p2251_p9 = scmp.lt.u32.totalorder %s2247_s30, %s3930_s1 }
  0x18   :  { %p2253_p10 = pnand %p2251_p9, %p2248_p8 }
  0x1a   :  { %2256 = shalt.err (!%p2253_p10)
}
  0x1b   :  { %s2257_s8 = scalar_lea.vmem %s31_s27, 1280  ;;  %p2262_p12 = scmp.lt.s32.totalorder %s31_s27, %s31_s27 }
  0x1c   :  { %p2258_p11 = scmp.ne.s32.totalorder %s31_s27, %s2257_s8  ;;  %p2263_p13 = scmp.lt.s32.totalorder %s2257_s8, %s2257_s8 }
  0x1e   :  { %p2264_p0 = por %p2263_p13, %p2262_p12 }
  0x20   :  { %p2265_p1 = pnand %p2264_p0, %p2258_p11 }
  0x22   :  { %2268 = shalt.err (!%p2265_p1)
}
  0x23   :  { %36 = dma.hbm_to_vmem [thread:$0]  %s3930_s1, 1280, %s31_s27, [#allocation6], %s2322_s22, %s2322_s22, %s2323_s23  }
  0x24   :  { %2313 = dma.done.wait [#allocation3], 1280  }
  0x25   :  { %2314 = vsyncadd [#allocation3], 4294966016 }
  0x26   :  { %2315 = dma.done.wait [#allocation6], 1280  }
  0x27   :  { %2316 = vsyncadd [#allocation6], 4294966016  ;;  %v45_v0 = vld [vmem:[#allocation2 + $0x10] sm:$0xff]  ;;  %v2373_v1 = vld [vmem:[#allocation5 + $0x10] sm:$0xff]  ;;  %vm133_vm0 = vcmask 531456   ;;  %vm168_vm1 = vcmask 1040384  }
  0x28   :  { %v43_v2 = vld [vmem:[#allocation2] sm:$0xff]  ;;  %v65_v3 = vsub.f32 %v2373_v1, %v45_v0  ;;  %v2376_v4 = vld [vmem:[#allocation5] sm:$0xff]  ;;  %v46_v5 = vld [vmem:[#allocation2 + $0x18] sm:$0xff]  ;;  %vm362_vm2 = vcmask 1041408   ;;  %2148 = vlog2.f32 %v45_v0  ;;  %v3942_v7 = vrot.slane %v2373_v1, 6  ;;  %s2325_s1 = smov [#allocation7]  }
  0x29   :  { %v2378_v6 = vld [vmem:[#allocation5 + $0x18] sm:$0xff]  ;;  %v63_v8 = vsub.f32 %v2376_v4, %v43_v2  ;;  %v2385_v11 = vld [vmem:[#allocation5 + $0x8] sm:$0xff]  ;;  %vm146_vm3 = vcmask 524288   ;;  %2150 = vlog2.f32 %v43_v2  ;;  %v2389_v14 = vmul.f32 %v2373_v1, %v2373_v1  ;;  %v2391_v17 = vld [vmem:[#allocation5 + $0x20] sm:$0x1]  ;;  %s2111_s10 = sshll.u32 %s2325_s1, 4  ;;  %s2112_s10 = int_to_ptr.vmem [resolvable:$true] %s2111_s10 }
  0x2a   :  { %v2383_v9 = vsub.f32 %v2378_v6, %v46_v5  ;;  %v44_v10 = vld [vmem:[#allocation2 + $0x8] sm:$0xff]  ;;  %v125_v12 = vmul.f32 %v65_v3, %v65_v3  ;;  %v366_v13 = vrot.slane %v65_v3, 6  ;;  %2152 = vlog2.f32 %v46_v5  ;;  %v2399_v24 = vld [vmem:[#allocation5 + $0x28] sm:$0xff]  ;;  %v47_v25 = vld [vmem:[#allocation2 + $0x20] sm:$0x1]  ;;  %s2269_s11 = scalar_lea.vmem %s2112_s10, 32  ;;  %p2274_p3 = scmp.lt.s32.totalorder %s2112_s10, %s2112_s10 }
  0x2b   :  { %v123_v15 = vmul.f32 %v63_v8, %v63_v8  ;;  %v350_v16 = vrot.slane %v63_v8, 7  ;;  %v3936_v21 = vrot.slane %v2378_v6, 6  ;;  %v64_v22 = vsub.f32 %v2385_v11, %v44_v10  ;;  %v48_v23 = vld [vmem:[#allocation2 + $0x28] sm:$0xff]  ;;  %v50_v44 = vld [vmem:[#allocation2 + $0x38] sm:$0xff]  ;;  %v49_v50 = vld [vmem:[#allocation2 + $0x30] sm:$0xff]  ;;  %p2270_p2 = scmp.ne.s32.totalorder %s2112_s10, %s2269_s11  ;;  %p2275_p4 = scmp.lt.s32.totalorder %s2269_s11, %s2269_s11 }
  0x2c   :  { %v126_v18 = vmul.f32 %v2383_v9, %v2383_v9  ;;  %v3933_v19 = vrot.slane %v2383_v9, 6  ;;  %v140_v20 = vsel %vm133_vm0, %v125_v12, 0.0  ;;  %v590_v29 = vrot.slane %v2391_v17, 6  ;;  %v2436_v45 = vld [vmem:[#allocation5 + $0x38] sm:$0xff]  ;;  %v2444_v51 = vld [vmem:[#allocation5 + $0x30] sm:$0xff] }
  0x2d   :  { %141 = vadd.xlane.f32.xlu1 %v140_v20  ;;  %v134_v26 = vsel %vm133_vm0, %v123_v15, 0.0  ;;  %v399_v27 = vsel %vm168_vm1, %v63_v8, %v350_v16  ;;  %v124_v31 = vmul.f32 %v64_v22, %v64_v22  ;;  %v363_v32 = vrot.slane %v63_v8, 6  ;;  %v52_v56 = vld [vmem:[#allocation2 + $0x48] sm:$0x1]  ;;  %v2463_v62 = vld [vmem:[#allocation5 + $0x48] sm:$0x1]  ;;  %p2276_p5 = por %p2275_p4, %p2274_p3 }
  0x2e   :  { %v2406_v28 = vsel %vm362_vm2, %v366_v13, %v3933_v19  ;;  %135 = vadd.xlane.f32.xlu0 %v134_v26  ;;  %v143_v30 = vsel %vm133_vm0, %v126_v18, 0.0  ;;  %v364_v33 = vrot.slane %v64_v22, 6  ;;  %v583_v34 = vrot.slane %v2376_v4, 6  ;;  %v51_v5 = vld [vmem:[#allocation2 + $0x40] sm:$0xff]  ;;  %v2469_v8 = vld [vmem:[#allocation5 + $0x40] sm:$0xff] }
  0x2f   :  { %v3938_v35 = vrot.slane %v2385_v11, 6  ;;  %v2413_v36 = vsub.f32 %v2399_v24, %v48_v23  ;;  %v2416_v37 = vsub.f32 %v2391_v17, %v47_v25  ;;  %2154 = vlog2.f32 %v44_v10  ;;  %p2277_p6 = pnand %p2276_p5, %p2270_p2 }
  0x30   :  { %v137_v38 = vsel %vm133_vm0, %v124_v31, 0.0  ;;  %v2420_v39 = vsel %vm362_vm2, %v363_v32, %v364_v33  ;;  %v2423_v40 = vsel %vm362_vm2, %v364_v33, %v366_v13  ;;  %v2428_v41 = vsel %vm362_vm2, %v3936_v21, %v590_v29 }
  0x31   :  { %144 = vadd.xlane.f32.xlu1 %v143_v30  ;;  %v2431_v42 = vsel %vm362_vm2, %v399_v27, %v363_v32  ;;  %v2434_v43 = vmul.f32 2.0, %v2420_v39  ;;  %2156 = vlog2.f32 %v48_v23  ;;  %v128_v47 = vmul.f32 %v2413_v36, %v2413_v36 }
  0x32   :  { %138 = vadd.xlane.f32.xlu0 %v137_v38  ;;  %v351_v48 = vrot.slane %v2413_v36, 7  ;;  %v127_v49 = vmul.f32 %v2416_v37, %v2416_v37  ;;  %v2446_v52 = vpop.eup %2148  ;;  %v2455_v55 = vsel %vm362_vm2, %v583_v34, %v3938_v35  ;;  %2158 = vlog2.f32 %v47_v25 }
  0x33   :  { %v2457_v57 = vpop.eup %2150  ;;  %v150_v58 = vsel %vm133_vm0, %v128_v47, 0.0  ;;  %v70_v61 = vsub.f32 %v2436_v45, %v50_v44  ;;  %v69_v2 = vsub.f32 %v2444_v51, %v49_v50  ;;  %v372_v3 = vrot.slane %v2413_v36, 6 }
  0x34   :  { %v147_v59 = vsel %vm146_vm3, %v127_v49, 0.0  ;;  %v2471_v10 = vpop.eup %2152  ;;  %v400_v12 = vsel %vm168_vm1, %v2413_v36, %v351_v48  ;;  %v592_v16 = vrot.slane %v2399_v24, 6  ;;  %vm403_vm4 = vcmask 1042432  }
  0x35   :  { %151 = vadd.xlane.f32.xlu1 %v150_v58  ;;  %v130_v13 = vmul.f32 %v70_v61, %v70_v61  ;;  %v375_v15 = vrot.slane %v70_v61, 6  ;;  %2160 = vlog2.f32 %v50_v44  ;;  %v129_v18 = vmul.f32 %v69_v2, %v69_v2 }
  0x36   :  { %148 = vadd.xlane.f32.xlu0 %v147_v59  ;;  %v373_v20 = vrot.slane %v69_v2, 6  ;;  %v3935_v22 = vrot.slane %v2444_v51, 6  ;;  %v2479_v25 = vsub.f32 %v2463_v62, %v52_v56  ;;  %2162 = vlog2.f32 %v2463_v62 }
  0x37   :  { %v156_v23 = vsel %vm133_vm0, %v130_v13, 0.0  ;;  %v71_v26 = vsub.f32 %v2469_v8, %v51_v5  ;;  %2164 = vlog2.f32 %v49_v50  ;;  %v153_v27 = vsel %vm133_vm0, %v129_v18, 0.0 }
  0x38   :  { %v2485_v29 = vsel %vm362_vm2, %v372_v3, %v373_v20  ;;  %v2488_v30 = vsel %vm362_vm2, %v373_v20, %v375_v15  ;;  %v2492_v33 = vsel %vm362_vm2, %v400_v12, %v372_v3  ;;  %v2499_v36 = vsel %vm362_vm2, %v592_v16, %v3935_v22 }
  0x39   :  { %157 = vadd.xlane.f32.xlu1 %v156_v23  ;;  %v2155_v31 = vpop.eup %2154  ;;  %2166 = vlog2.f32 %v52_v56  ;;  %v132_v47 = vmul.f32 %v2479_v25, %v2479_v25  ;;  %v131_v48 = vmul.f32 %v71_v26, %v71_v26  ;;  %v377_v50 = vrot.slane %v71_v26, 6 }
  0x3a   :  { %154 = vadd.xlane.f32.xlu0 %v153_v27  ;;  %2168 = vlog2.f32 %v2469_v8  ;;  %v379_v58 = vrot.slane %v2479_v25, 6  ;;  %v2510_v61 = vmul.f32 2.0, %v2485_v29  ;;  %v392_v3 = vrot.slane %v2479_v25, 5 }
  0x3b   :  { %v2501_v38 = vpop.eup %2156  ;;  %2170 = vlog2.f32 %v51_v5  ;;  %v162_v56 = vsel %vm146_vm3, %v132_v47, 0.0  ;;  %v159_v2 = vsel %vm133_vm0, %v131_v48, 0.0  ;;  %v2516_v12 = vsel %vm362_vm2, %v375_v15, %v377_v50 }
  0x3c   :  { %v2159_v59 = vpop.eup %2158  ;;  %v380_v13 = vsel %vm362_vm2, %v377_v50, %v379_v58  ;;  %v599_v5 = vrot.slane %v2463_v62, 6  ;;  %v189_v18 = vmul.f32 %v2385_v11, %v2385_v11  ;;  %v188_v26 = vmul.f32 %v2376_v4, %v2376_v4 }
  0x3d   :  { %163 = vadd.xlane.f32.xlu1 %v162_v56  ;;  %v2524_v23 = vsel %vm403_vm4, %v380_v13, %v392_v3  ;;  %v191_v15 = vmul.f32 %v2378_v6, %v2378_v6  ;;  %v3934_v27 = vrot.slane %v2469_v8, 6  ;;  %v193_v48 = vmul.f32 %v2399_v24, %v2399_v24 }
  0x3e   :  { %160 = vadd.xlane.f32.xlu0 %v159_v2  ;;  %v201_v47 = vsel %vm133_vm0, %v189_v18, 0.0  ;;  %v192_v50 = vmul.f32 %v2391_v17, %v2391_v17  ;;  %v198_v2 = vsel %vm133_vm0, %v188_v26, 0.0  ;;  %v195_v3 = vmul.f32 %v2436_v45, %v2436_v45 }
  0x3f   :  { %v2536_v58 = vpop.eup %2160  ;;  %v194_v13 = vmul.f32 %v2444_v51, %v2444_v51  ;;  %v2547_v18 = vsel %vm362_vm2, %v3934_v27, %v599_v5  ;;  %v207_v0 = vsel %vm133_vm0, %v191_v15, 0.0  ;;  %v204_v63 = vsel %vm133_vm0, %v2389_v14, 0.0 }
  0x40   :  { %v2163_v20 = vpop.eup %2162  ;;  %v197_v26 = vmul.f32 %v2463_v62, %v2463_v62  ;;  %v213_v56 = vsel %vm133_vm0, %v193_v48, 0.0  ;;  %v210_v49 = vsel %vm146_vm3, %v192_v50, 0.0  ;;  %2172 = vlog2.f32 %v2385_v11 }
  0x41   :  { %202 = vadd.xlane.f32.xlu1 %v201_v47  ;;  %v2165_v19 = vpop.eup %2164  ;;  %v92_v60 = vmul.f32 0.6931472, %v2163_v20  ;;  %vm423_vm5 = vcmask 1046528   ;;  %v219_v47 = vsel %vm133_vm0, %v195_v3, 0.0  ;;  %v216_v15 = vsel %vm133_vm0, %v194_v13, 0.0 }
  0x42   :  { %199 = vadd.xlane.f32.xlu0 %v198_v2  ;;  %v196_v14 = vmul.f32 %v2469_v8, %v2469_v8  ;;  %2174 = vlog2.f32 %v2376_v4  ;;  %vm462_vm6 = vcmask 1044480   ;;  %v2563_v48 = vsel %vm146_vm3, %v197_v26, 0.0 }
  0x43   :  { %v2167_v5 = vpop.eup %2166  ;;  %v96_v50 = vmul.f32 0.6931472, %v2155_v31  ;;  %2176 = vlog2.f32 %v2378_v6  ;;  %v94_v3 = vmul.f32 0.6931472, %v2457_v57  ;;  %v100_v13 = vmul.f32 0.6931472, %v2471_v10 }
  0x44   :  { %v2169_v2 = vpop.eup %2168  ;;  %v112_v20 = vmul.f32 0.6931472, %v2167_v5  ;;  %2178 = vlog2.f32 %v2373_v1  ;;  %vm406_vm7 = vcmask 1043456   ;;  %v98_v26 = vmul.f32 0.6931472, %v2446_v52 }
  0x45   :  { %v2171_v44 = vpop.eup %2170  ;;  %v90_v54 = vmul.f32 0.6931472, %v2169_v2  ;;  %208 = vadd.xlane.f32.xlu1 %v207_v0  ;;  %2180 = vlog2.f32 %v2399_v24  ;;  %v222_v31 = vsel %vm133_vm0, %v196_v14, 0.0  ;;  %v104_v2 = vmul.f32 0.6931472, %v2501_v38 }
  0x46   :  { %205 = vadd.xlane.f32.xlu0 %v204_v63  ;;  %v2569_v53 = vsub.f32 %v92_v60, %v112_v20  ;;  %v110_v5 = vmul.f32 0.6931472, %v2171_v44  ;;  %v2575_v0 = vmul.f32 0.6931472, %v2159_v59  ;;  %v571_v57 = vrot.slane %v2376_v4, 7 }
  0x47   :  { %2182 = vlog2.f32 %v2391_v17  ;;  %v2583_v60 = vmul.f32 2.0, %v2455_v55  ;;  %v3941_v38 = vrot.slane %v2455_v55, 1  ;;  %v3940_v44 = vrot.slane %v2455_v55, 3 }
  0x48   :  { %3981 = vst [vmem:[#allocation14_spill] sm:$0xff] %v2569_v53  ;;  %v2578_v63 = vsub.f32 %v90_v54, %v110_v5  ;;  %v815_v10 = vrot.slane %v2569_v53, 6  ;;  %v619_v52 = vsel %vm168_vm1, %v2376_v4, %v571_v57  ;;  %v572_v59 = vrot.slane %v2399_v24, 7 }
  0x49   :  { %214 = vadd.xlane.f32.xlu1 %v213_v56  ;;  %v621_v14 = vsel %vm362_vm2, %v619_v52, %v583_v34  ;;  %2184 = vlog2.f32 %v2444_v51  ;;  %v2595_v20 = vmul.f32 0.6931472, %v2165_v19  ;;  %v3939_v22 = vrot.slane %v2583_v60, 4 }
  0x4a   :  { %211 = vadd.xlane.f32.xlu0 %v210_v49  ;;  %v3937_v54 = vrot.slane %v2578_v63, 6  ;;  %v627_v49 = vmul.f32 -2.0, %v621_v14  ;;  %v641_v56 = vrot.slane %v621_v14, 1  ;;  %v679_v5 = vrot.slane %v621_v14, 3  ;;  %v2173_v46 = vpop.eup %2172 }
  0x4b   :  { %v717_v57 = vmul.f32 2.0, %v621_v14  ;;  %v620_v4 = vsel %vm168_vm1, %v2399_v24, %v572_v59  ;;  %v76_v19 = vmul.f32 0.6931472, %v2173_v46 }
  0x4c   :  { %v2600_v27 = vsel %vm362_vm2, %v3937_v54, %v815_v10  ;;  %v2175_v52 = vpop.eup %2174  ;;  %v643_v14 = vsel %vm423_vm5, %v641_v56, %v3941_v38  ;;  %v681_v59 = vsel %vm462_vm6, %v679_v5, %v3940_v44  ;;  %v2621_v56 = vmul.f32 2.0, %v2499_v36 }
  0x4d   :  { %3982 = vst [vmem:[#allocation15_spill] sm:$0xff] %v2600_v27  ;;  %220 = vadd.xlane.f32.xlu1 %v219_v47  ;;  %v737_v32 = vrot.slane %v717_v57, 4  ;;  %v2177_v10 = vpop.eup %2176  ;;  %v74_v54 = vmul.f32 0.6931472, %v2175_v52  ;;  %v669_v35 = vsub.f32 %v627_v49, %v643_v14  ;;  %v2616_v47 = vsel %vm362_vm2, %v620_v4, %v592_v16 }
  0x4e   :  { %217 = vadd.xlane.f32.xlu0 %v216_v15  ;;  %v2179_v46 = vpop.eup %2178  ;;  %v2618_v15 = vsub.f32 %v76_v19, %v96_v50  ;;  %v80_v34 = vmul.f32 0.6931472, %v2177_v10  ;;  %v3983_v49 = vrot.slane %v2385_v11, 6  ;;  %v2636_v50 = vmul.f32 -2.0, %v2616_v47 }
  0x4f   :  { %v2181_v5 = vpop.eup %2180  ;;  %v2630_v52 = vsub.f32 %v74_v54, %v94_v3  ;;  %v78_v24 = vmul.f32 0.6931472, %v2179_v46  ;;  %v739_v16 = vsel %vm406_vm7, %v737_v32, %v3939_v22  ;;  %v707_v14 = vadd.f32 %v681_v59, %v669_v35 }
  0x50   :  { %v2628_v57 = vsel %vm362_vm2, %v3983_v49, %v3942_v7  ;;  %v285_v4 = vand.u32 2147483647, %v2618_v15  ;;  %v2640_v11 = vsub.f32 %v80_v34, %v100_v13  ;;  %v84_v19 = vmul.f32 0.6931472, %v2181_v5 }
  0x51   :  { %226 = vadd.xlane.f32.xlu1 %v2563_v48  ;;  %v2183_v10 = vpop.eup %2182  ;;  %v284_v3 = vand.u32 2147483647, %v2630_v52  ;;  %v787_v54 = vrot.slane %v2630_v52, 7  ;;  %v115_v46 = vsub.f32 %v78_v24, %v98_v26  ;;  %v650_v32 = vrot.slane %v2616_v47, 1 }
  0x52   :  { %223 = vadd.xlane.f32.xlu0 %v222_v31  ;;  %3984 = vst [vmem:[#allocation16_spill] sm:$0xff] %v2640_v11  ;;  %v297_v49 = vsel %vm133_vm0, %v285_v4, 0.0  ;;  %v287_v22 = vand.u32 2147483647, %v2640_v11  ;;  %v3944_v48 = vrot.slane %v2640_v11, 6  ;;  %v118_v31 = vsub.f32 %v84_v19, %v104_v2 }
  0x53   :  { %v2185_v44 = vpop.eup %2184  ;;  %v3943_v13 = vrot.slane %v2618_v15, 6  ;;  %v294_v35 = vsel %vm133_vm0, %v284_v3, 0.0  ;;  %v286_v34 = vand.u32 2147483647, %v115_v46  ;;  %v802_v59 = vrot.slane %v115_v46, 6 }
  0x54   :  { %v303_v26 = vsel %vm133_vm0, %v287_v22, 0.0  ;;  %v289_v24 = vand.u32 2147483647, %v118_v31  ;;  %v788_v4 = vrot.slane %v118_v31, 7  ;;  %v82_v3 = vmul.f32 0.6931472, %v2183_v10 }
  0x55   :  { %298 = vadd.xlane.f32.xlu1 %v297_v49  ;;  %v300_v38 = vsel %vm133_vm0, %v286_v34, 0.0  ;;  %v2656_v2 = vsel %vm362_vm2, %v3943_v13, %v802_v59  ;;  %v2661_v19 = vsel %vm362_vm2, %v802_v59, %v3944_v48  ;;  %v835_v46 = vsel %vm168_vm1, %v2630_v52, %v787_v54 }
  0x56   :  { %295 = vadd.xlane.f32.xlu0 %v294_v35  ;;  %v836_v22 = vsel %vm168_vm1, %v118_v31, %v788_v4  ;;  %v765_v49 = vadd.f32 %v739_v16, %v707_v14  ;;  %v86_v35 = vmul.f32 0.6931472, %v2185_v44  ;;  %v2667_v34 = vsub.f32 %v82_v3, %v2575_v0 }
  0x57   :  { %v808_v7 = vrot.slane %v118_v31, 6  ;;  %v3985_v13 = vrot.slane %v2499_v36, 1  ;;  %v688_v5 = vrot.slane %v2616_v47, 3  ;;  %v722_v44 = vmul.f32 2.0, %v2616_v47 }
  0x58   :  { %v2673_v10 = vmul.f32 0.1, %v765_v49  ;;  %v2676_v54 = vsub.f32 %v86_v35, %v2595_v20  ;;  %v3986_v0 = vrot.slane %v2630_v52, 6  ;;  %v288_v31 = vand.u32 2147483647, %v2667_v34 }
  0x59   :  { %v652_v21 = vsel %vm423_vm5, %v650_v32, %v3985_v13  ;;  %304 = vadd.xlane.f32.xlu1 %v303_v26  ;;  %v309_v32 = vsel %vm133_vm0, %v289_v24, 0.0  ;;  %v2695_v59 = vsel %vm362_vm2, %v836_v22, %v808_v7  ;;  %v3987_v26 = vrot.slane %v2499_v36, 3 }
  0x5a   :  { %301 = vadd.xlane.f32.xlu0 %v300_v38  ;;  %v674_v16 = vsub.f32 %v2636_v50, %v652_v21  ;;  %v2683_v14 = vsel %vm362_vm2, %v835_v46, %v3986_v0  ;;  %v3946_v38 = vrot.slane %v2621_v56, 4  ;;  %v1063_v13 = vmul.f32 %v2673_v10, %v2673_v10 }
  0x5b   :  { %v1445_v20 = vrot.slane %v2673_v10, 7  ;;  %v290_v21 = vand.u32 2147483647, %v2676_v54  ;;  %v3945_v47 = vrot.slane %v2676_v54, 6  ;;  %v306_v50 = vsel %vm146_vm3, %v288_v31, 0.0 }
  0x5c   :  { %v690_v24 = vsel %vm462_vm6, %v688_v5, %v3987_v26  ;;  %v746_v4 = vrot.slane %v722_v44, 4  ;;  %v1073_v3 = vsel %vm133_vm0, %v1063_v13, 0.0  ;;  %v644_v13 = vrot.slane %v2628_v57, 1 }
  0x5d   :  { %310 = vadd.xlane.f32.xlu1 %v309_v32  ;;  %v312_v46 = vsel %vm133_vm0, %v290_v21, 0.0  ;;  %v2705_v49 = vsel %vm362_vm2, %v808_v7, %v3945_v47  ;;  %v712_v35 = vadd.f32 %v690_v24, %v674_v16  ;;  %v628_v32 = vmul.f32 -2.0, %v2455_v55 }
  0x5e   :  { %307 = vadd.xlane.f32.xlu0 %v306_v50  ;;  %v2710_v31 = vmul.f32 2.0, %v2705_v49  ;;  %v748_v5 = vsel %vm406_vm7, %v746_v4, %v3946_v38  ;;  %v682_v7 = vrot.slane %v2628_v57, 3  ;;  %v719_v21 = vmul.f32 2.0, %v2628_v57 }
  0x5f   :  { %v770_v44 = vadd.f32 %v748_v5, %v712_v35  ;;  %v1457_v50 = vrot.slane %v2673_v10, 6  ;;  %v3988_v26 = vrot.slane %v2378_v6, 6  ;;  %v3989_v24 = vrot.slane %v2373_v1, 6 }
  0x60   :  { %v3990_v35 = vrot.slane %v2455_v55, 1  ;;  %v3991_v47 = vrot.slane %v2455_v55, 3  ;;  %v629_v0 = vmul.f32 -2.0, %v2628_v57  ;;  %v740_v22 = vrot.slane %v719_v21, 4 }
  0x61   :  { %v2726_v48 = vsel %vm362_vm2, %v3989_v24, %v3988_v26  ;;  %1074 = vadd.xlane.f32.xlu1 %v1073_v3  ;;  %v2728_v4 = vmul.f32 0.1, %v770_v44  ;;  %v3992_v55 = vrot.slane %v2436_v45, 6  ;;  %v3994_v21 = vrot.slane %v2583_v60, 4 }
  0x62   :  { %313 = vadd.xlane.f32.xlu0 %v312_v46  ;;  %v645_v5 = vsel %vm423_vm5, %v3990_v35, %v644_v13  ;;  %v683_v16 = vsel %vm462_vm6, %v3991_v47, %v682_v7  ;;  %v3949_v1 = vrot.slane %v2726_v48, 1  ;;  %v3947_v26 = vrot.slane %v2726_v48, 3 }
  0x63   :  { %v670_v6 = vsub.f32 %v628_v32, %v645_v5  ;;  %v1068_v3 = vmul.f32 %v2728_v4, %v2728_v4  ;;  %v2743_v44 = vmul.f32 2.0, %v2726_v48  ;;  %v3993_v47 = vrot.slane %v2444_v51, 6 }
  0x64   :  { %v741_v24 = vsel %vm406_vm7, %v3994_v21, %v740_v22  ;;  %v647_v35 = vsel %vm423_vm5, %v644_v13, %v3949_v1  ;;  %v685_v5 = vsel %vm462_vm6, %v682_v7, %v3947_v26  ;;  %v3998_v1 = vrot.slane %v2436_v45, 6 }
  0x65   :  { %v2750_v57 = vsel %vm362_vm2, %v3993_v47, %v3992_v55  ;;  %v708_v32 = vadd.f32 %v683_v16, %v670_v6  ;;  %v1088_v46 = vsel %vm133_vm0, %v1068_v3, 0.0  ;;  %v671_v38 = vsub.f32 %v629_v0, %v647_v35 }
  0x66   :  { %v3948_v51 = vrot.slane %v2743_v44, 4  ;;  %v633_v55 = vmul.f32 -2.0, %v2499_v36  ;;  %1089 = vadd.xlane.f32.xlu1 %v1088_v46  ;;  %v653_v60 = vrot.slane %v2750_v57, 1  ;;  %v691_v6 = vrot.slane %v2750_v57, 3 }
  0x67   :  { %v766_v16 = vadd.f32 %v741_v24, %v708_v32  ;;  %v2767_v47 = vmul.f32 2.0, %v2750_v57  ;;  %v709_v13 = vadd.f32 %v685_v5, %v671_v38  ;;  %v1466_v0 = vrot.slane %v2728_v4, 6 }
  0x68   :  { %v743_v7 = vsel %vm406_vm7, %v740_v22, %v3948_v51  ;;  %v1493_v3 = vsel %vm168_vm1, %v2673_v10, %v1445_v20  ;;  %v3995_v46 = vrot.slane %v2499_v36, 1  ;;  %v3996_v24 = vrot.slane %v2499_v36, 3 }
  0x69   :  { %v776_v21 = vmul.f32 0.1, %v766_v16  ;;  %v749_v38 = vrot.slane %v2767_v47, 4  ;;  %v767_v5 = vadd.f32 %v743_v7, %v709_v13  ;;  %v1495_v22 = vsel %vm362_vm2, %v1493_v3, %v1457_v50 }
  0x6a   :  { %v654_v32 = vsel %vm423_vm5, %v3995_v46, %v653_v60  ;;  %v692_v35 = vsel %vm462_vm6, %v3996_v24, %v691_v6  ;;  %v3997_v51 = vrot.slane %v2469_v8, 6  ;;  %v3999_v46 = vrot.slane %v2621_v56, 4 }
  0x6b   :  { %v675_v26 = vsub.f32 %v633_v55, %v654_v32  ;;  %v1064_v20 = vmul.f32 %v776_v21, %v776_v21  ;;  %v1458_v16 = vrot.slane %v776_v21, 6  ;;  %v1501_v24 = vmul.f32 -2.0, %v1495_v22 }
  0x6c   :  { %v2788_v10 = vsel %vm362_vm2, %v3998_v1, %v3997_v51  ;;  %v750_v36 = vsel %vm406_vm7, %v3999_v46, %v749_v38  ;;  %v2793_v27 = vmul.f32 0.1, %v767_v5  ;;  %v1515_v55 = vrot.slane %v1495_v22, 1 }
  0x6d   :  { %v713_v47 = vadd.f32 %v692_v35, %v675_v26  ;;  %v1553_v13 = vrot.slane %v1495_v22, 3  ;;  %v1076_v7 = vsel %vm133_vm0, %v1064_v20, 0.0  ;;  %v2797_v8 = vsel %vm362_vm2, %v1457_v50, %v1458_v16 }
  0x6e   :  { %v1591_v45 = vmul.f32 2.0, %v1495_v22  ;;  %v634_v1 = vmul.f32 -2.0, %v2750_v57  ;;  %1077 = vadd.xlane.f32.xlu0 %v1076_v7  ;;  %v1065_v56 = vmul.f32 %v2793_v27, %v2793_v27  ;;  %v3953_v51 = vrot.slane %v2793_v27, 6 }
  0x6f   :  { %v771_v3 = vadd.f32 %v750_v36, %v713_v47  ;;  %v1516_v21 = vrot.slane %v2797_v8, 1  ;;  %v1554_v26 = vrot.slane %v2797_v8, 3  ;;  %v2806_v32 = vmul.f32 2.0, %v2797_v8 }
  0x70   :  { %v1611_v35 = vrot.slane %v1591_v45, 4  ;;  %v3955_v50 = vrot.slane %v2788_v10, 1  ;;  %v1079_v5 = vsel %vm133_vm0, %v1065_v56, 0.0  ;;  %v2813_v57 = vsel %vm362_vm2, %v1458_v16, %v3953_v51 }
  0x71   :  { %v781_v22 = vmul.f32 0.1, %v771_v3  ;;  %v1517_v20 = vsel %vm423_vm5, %v1515_v55, %v1516_v21  ;;  %1080 = vadd.xlane.f32.xlu1 %v1079_v5  ;;  %v1555_v36 = vsel %vm462_vm6, %v1553_v13, %v1554_v26  ;;  %v1612_v47 = vrot.slane %v2806_v32, 4 }
  0x72   :  { %v1543_v46 = vsub.f32 %v1501_v24, %v1517_v20  ;;  %v656_v7 = vsel %vm423_vm5, %v653_v60, %v3955_v50  ;;  %v3954_v11 = vrot.slane %v2788_v10, 3  ;;  %v2824_v55 = vmul.f32 2.0, %v2788_v10 }
  0x73   :  { %v1069_v45 = vmul.f32 %v781_v22, %v781_v22  ;;  %v1467_v56 = vrot.slane %v781_v22, 6  ;;  %v676_v53 = vsub.f32 %v634_v1, %v656_v7  ;;  %v1613_v3 = vsel %vm406_vm7, %v1611_v35, %v1612_v47 }
  0x74   :  { %v1581_v16 = vadd.f32 %v1555_v36, %v1543_v46  ;;  %v4000_v24 = vrot.slane %v2728_v4, 7  ;;  %v694_v1 = vsel %vm462_vm6, %v691_v6, %v3954_v11  ;;  %v3956_v20 = vrot.slane %v2824_v55, 4 }
  0x75   :  { %v1091_v32 = vsel %vm133_vm0, %v1069_v45, 0.0  ;;  %v2832_v60 = vsel %vm362_vm2, %v1466_v0, %v1467_v56  ;;  %v714_v22 = vadd.f32 %v694_v1, %v676_v53 }
  0x76   :  { %v1494_v13 = vsel %vm168_vm1, %v2728_v4, %v4000_v24  ;;  %1092 = vadd.xlane.f32.xlu0 %v1091_v32  ;;  %v1639_v35 = vadd.f32 %v1613_v3, %v1581_v16  ;;  %v1525_v4 = vrot.slane %v2832_v60, 1  ;;  %v1563_v45 = vrot.slane %v2832_v60, 3 }
  0x77   :  { %v1496_v5 = vsel %vm362_vm2, %v1494_v13, %v1466_v0  ;;  %v752_v51 = vsel %vm406_vm7, %v749_v38, %v3956_v20  ;;  %v2845_v0 = vmul.f32 2.0, %v2832_v60  ;;  %v1502_v13 = vmul.f32 -2.0, %v2797_v8 }
  0x78   :  { %v1506_v46 = vmul.f32 -2.0, %v1496_v5  ;;  %v1524_v36 = vrot.slane %v1496_v5, 1  ;;  %v1562_v7 = vrot.slane %v1496_v5, 3  ;;  %v1649_v24 = vmul.f32 0.1, %v1639_v35 }
  0x79   :  { %v1596_v6 = vmul.f32 2.0, %v1496_v5  ;;  %v772_v16 = vadd.f32 %v752_v51, %v714_v22  ;;  %v1621_v35 = vrot.slane %v2845_v0, 4  ;;  %v1518_v38 = vrot.slane %v2813_v57, 1 }
  0x7a   :  { %v1526_v53 = vsel %vm423_vm5, %v1524_v36, %v1525_v4  ;;  %v1564_v3 = vsel %vm462_vm6, %v1562_v7, %v1563_v45  ;;  %v1937_v32 = vmul.f32 %v1649_v24, %v1649_v24  ;;  %v1556_v5 = vrot.slane %v2813_v57, 3 }
  0x7b   :  { %v1548_v1 = vsub.f32 %v1506_v46, %v1526_v53  ;;  %v1620_v11 = vrot.slane %v1596_v6, 4  ;;  %v2851_v50 = vmul.f32 0.1, %v772_v16  ;;  %v2856_v20 = vmul.f32 2.0, %v2813_v57 }
  0x7c   :  { %v1947_v51 = vsel %vm133_vm0, %v1937_v32, 0.0  ;;  %v611_v8 = vrot.slane %v2391_v17, 5  ;;  %v1519_v24 = vsel %vm423_vm5, %v1516_v21, %v1518_v38  ;;  %v1557_v6 = vsel %vm462_vm6, %v1554_v26, %v1556_v5 }
  0x7d   :  { %v1586_v22 = vadd.f32 %v1564_v3, %v1548_v1  ;;  %v1622_v36 = vsel %vm406_vm7, %v1620_v11, %v1621_v35  ;;  %1948 = vadd.xlane.f32.xlu1 %v1947_v51  ;;  %v1070_v46 = vmul.f32 %v2851_v50, %v2851_v50  ;;  %v3957_v7 = vrot.slane %v2851_v50, 6 }
  0x7e   :  { %v1544_v16 = vsub.f32 %v1502_v13, %v1519_v24  ;;  %v3958_v11 = vrot.slane %v2856_v20, 4  ;;  %v615_v53 = vrot.slane %v2391_v17, 4  ;;  %v623_v21 = vsel %vm403_vm4, %v2428_v41, %v611_v8 }
  0x7f   :  { %v1644_v0 = vadd.f32 %v1622_v36, %v1586_v22  ;;  %v1094_v3 = vsel %vm133_vm0, %v1070_v46, 0.0  ;;  %v2876_v32 = vsel %vm362_vm2, %v1467_v56, %v3957_v7  ;;  %v630_v1 = vmul.f32 -2.0, %v2726_v48 }
  0x80   :  { %1095 = vadd.xlane.f32.xlu0 %v1094_v3  ;;  %v1582_v51 = vadd.f32 %v1557_v6, %v1544_v16  ;;  %v1615_v13 = vsel %vm406_vm7, %v1612_v47, %v3958_v11  ;;  %v625_v17 = vsel %vm406_vm7, %v623_v21, %v615_v53  ;;  %v1507_v56 = vmul.f32 -2.0, %v2832_v60 }
  0x81   :  { %v1654_v26 = vmul.f32 0.1, %v1644_v0  ;;  %v648_v22 = vrot.slane %v625_v17, 1  ;;  %v686_v36 = vrot.slane %v625_v17, 3  ;;  %v2885_v46 = vmul.f32 2.0, %v625_v17 }
  0x82   :  { %v1640_v7 = vadd.f32 %v1615_v13, %v1582_v51  ;;  %v3961_v41 = vrot.slane %v2876_v32, 1  ;;  %v3960_v8 = vrot.slane %v2876_v32, 3  ;;  %v4001_v6 = vrot.slane %v2726_v48, 1 }
  0x83   :  { %v1942_v24 = vmul.f32 %v1654_v26, %v1654_v26  ;;  %v4002_v47 = vrot.slane %v2726_v48, 3  ;;  %v744_v53 = vrot.slane %v2885_v46, 4  ;;  %v2898_v3 = vmul.f32 2.0, %v2876_v32 }
  0x84   :  { %v649_v0 = vsel %vm423_vm5, %v4001_v6, %v648_v22  ;;  %v1650_v21 = vmul.f32 0.1, %v1640_v7  ;;  %v1528_v51 = vsel %vm423_vm5, %v1525_v4, %v3961_v41  ;;  %v4003_v13 = vrot.slane %v2743_v44, 4 }
  0x85   :  { %v687_v16 = vsel %vm462_vm6, %v4002_v47, %v686_v36  ;;  %v1962_v60 = vsel %vm133_vm0, %v1942_v24, 0.0  ;;  %v672_v26 = vsub.f32 %v630_v1, %v649_v0  ;;  %v1549_v6 = vsub.f32 %v1507_v56, %v1528_v51 }
  0x86   :  { %1963 = vadd.xlane.f32.xlu1 %v1962_v60  ;;  %v745_v48 = vsel %vm406_vm7, %v4003_v13, %v744_v53  ;;  %v1566_v46 = vsel %vm462_vm6, %v1563_v45, %v3960_v8  ;;  %v3959_v47 = vrot.slane %v2898_v3, 4  ;;  %v1938_v11 = vmul.f32 %v1650_v21, %v1650_v21 }
  0x87   :  { %v710_v24 = vadd.f32 %v687_v16, %v672_v26  ;;  %v1503_v7 = vmul.f32 -2.0, %v2813_v57  ;;  %v612_v1 = vrot.slane %v2463_v62, 5  ;;  %v1587_v0 = vadd.f32 %v1566_v46, %v1549_v6 }
  0x88   :  { %v1624_v44 = vsel %vm406_vm7, %v1621_v35, %v3959_v47  ;;  %v616_v4 = vrot.slane %v2463_v62, 4  ;;  %v635_v56 = vmul.f32 -2.0, %v2788_v10  ;;  %v1950_v60 = vsel %vm133_vm0, %v1938_v11, 0.0 }
  0x89   :  { %v768_v45 = vadd.f32 %v745_v48, %v710_v24  ;;  %v624_v21 = vsel %vm403_vm4, %v2547_v18, %v612_v1  ;;  %v631_v16 = vmul.f32 -2.0, %v625_v17  ;;  %1951 = vadd.xlane.f32.xlu0 %v1950_v60  ;;  %v1645_v26 = vadd.f32 %v1624_v44, %v1587_v0 }
  0x8a   :  { %v626_v51 = vsel %vm406_vm7, %v624_v21, %v616_v4  ;;  %v2923_v13 = vmul.f32 -2.0, %v2876_v32  ;;  %v2926_v35 = vmul.f32 -2.0, %v2431_v42  ;;  %v424_v18 = vrot.slane %v2431_v42, 1 }
  0x8b   :  { %v778_v62 = vmul.f32 0.1, %v768_v45  ;;  %v657_v6 = vrot.slane %v626_v51, 1  ;;  %v695_v46 = vrot.slane %v626_v51, 3  ;;  %v726_v47 = vmul.f32 2.0, %v626_v51 }
  0x8c   :  { %v1655_v11 = vmul.f32 0.1, %v1645_v26  ;;  %v673_v48 = vsub.f32 %v631_v16, %v648_v22  ;;  %v636_v24 = vmul.f32 -2.0, %v626_v51  ;;  %v4004_v0 = vrot.slane %v2788_v10, 1 }
  0x8d   :  { %v1066_v17 = vmul.f32 %v778_v62, %v778_v62  ;;  %v1462_v1 = vrot.slane %v778_v62, 6  ;;  %v4005_v4 = vrot.slane %v2788_v10, 3  ;;  %v753_v8 = vrot.slane %v726_v47, 4 }
  0x8e   :  { %v658_v44 = vsel %vm423_vm5, %v4004_v0, %v657_v6  ;;  %v1943_v21 = vmul.f32 %v1655_v11, %v1655_v11  ;;  %v711_v41 = vadd.f32 %v686_v36, %v673_v48  ;;  %v4006_v22 = vrot.slane %v2793_v27, 6 }
  0x8f   :  { %v696_v60 = vsel %vm462_vm6, %v4005_v4, %v695_v46  ;;  %v677_v45 = vsub.f32 %v635_v56, %v658_v44  ;;  %v1082_v26 = vsel %vm133_vm0, %v1066_v17, 0.0  ;;  %v678_v51 = vsub.f32 %v636_v24, %v657_v6 }
  0x90   :  { %v2939_v16 = vsel %vm362_vm2, %v4006_v22, %v1462_v1  ;;  %v4007_v62 = vrot.slane %v2420_v39, 1  ;;  %1083 = vadd.xlane.f32.xlu1 %v1082_v26  ;;  %v1965_v10 = vsel %vm133_vm0, %v1943_v21, 0.0  ;;  %v4008_v11 = vrot.slane %v2824_v55, 4 }
  0x91   :  { %v1520_v56 = vrot.slane %v2939_v16, 1  ;;  %v1558_v36 = vrot.slane %v2939_v16, 3  ;;  %v2950_v47 = vmul.f32 2.0, %v2939_v16  ;;  %1966 = vadd.xlane.f32.xlu0 %v1965_v10  ;;  %v715_v27 = vadd.f32 %v696_v60, %v677_v45 }
  0x92   :  { %v2944_v0 = vsel %vm423_vm5, %v424_v18, %v4007_v62  ;;  %v754_v6 = vsel %vm406_vm7, %v4008_v11, %v753_v8  ;;  %v769_v48 = vadd.f32 %v744_v53, %v711_v41  ;;  %v1504_v24 = vmul.f32 -2.0, %v2939_v16 }
  0x93   :  { %v1521_v18 = vsel %vm423_vm5, %v1518_v38, %v1520_v56  ;;  %v1559_v17 = vsel %vm462_vm6, %v1556_v5, %v1558_v36  ;;  %v1616_v44 = vrot.slane %v2950_v47, 4  ;;  %v716_v4 = vadd.f32 %v695_v46, %v678_v51 }
  0x94   :  { %v1545_v21 = vsub.f32 %v1503_v7, %v1521_v18  ;;  %v773_v60 = vadd.f32 %v754_v6, %v715_v27  ;;  %v779_v45 = vmul.f32 0.1, %v769_v48  ;;  %v452_v55 = vsub.f32 %v2926_v35, %v2944_v0 }
  0x95   :  { %v4009_v41 = vrot.slane %v2856_v20, 4  ;;  %v774_v26 = vadd.f32 %v753_v8, %v716_v4  ;;  %v463_v38 = vrot.slane %v2431_v42, 3  ;;  %v2970_v57 = vmul.f32 2.0, %v2431_v42 }
  0x96   :  { %v1583_v5 = vadd.f32 %v1559_v17, %v1545_v21  ;;  %v783_v22 = vmul.f32 0.1, %v773_v60  ;;  %v1067_v16 = vmul.f32 %v779_v45, %v779_v45  ;;  %v1464_v46 = vrot.slane %v779_v45, 6 }
  0x97   :  { %v1617_v53 = vsel %vm406_vm7, %v4009_v41, %v1616_v44  ;;  %v1485_v7 = vrot.slane %v779_v45, 5  ;;  %v1489_v51 = vrot.slane %v779_v45, 4  ;;  %v784_v62 = vmul.f32 0.1, %v774_v26 }
  0x98   :  { %v4010_v10 = vrot.slane %v2420_v39, 3  ;;  %v1641_v20 = vadd.f32 %v1617_v53, %v1583_v5  ;;  %v1071_v0 = vmul.f32 %v783_v22, %v783_v22  ;;  %v1471_v47 = vrot.slane %v783_v22, 6 }
  0x99   :  { %v1085_v8 = vsel %vm146_vm3, %v1067_v16, 0.0  ;;  %v1465_v27 = vsel %vm362_vm2, %v1462_v1, %v1464_v46  ;;  %v1072_v42 = vmul.f32 %v784_v62, %v784_v62  ;;  %v1473_v11 = vrot.slane %v784_v62, 6 }
  0x9a   :  { %v465_v35 = vsel %vm462_vm6, %v463_v38, %v4010_v10  ;;  %v1486_v6 = vrot.slane %v784_v62, 5  ;;  %v1651_v48 = vmul.f32 0.1, %v1641_v20  ;;  %v1097_v18 = vsel %vm133_vm0, %v1071_v0, 0.0 }
  0x9b   :  { %v4011_v17 = vrot.slane %v2851_v50, 6  ;;  %v1497_v21 = vsel %vm403_vm4, %v1465_v27, %v1485_v7  ;;  %1098 = vadd.xlane.f32.xlu0 %v1097_v18  ;;  %v4012_v22 = vrot.slane %v2876_v32, 1  ;;  %v4013_v50 = vrot.slane %v2876_v32, 3 }
  0x9c   :  { %v1499_v53 = vsel %vm406_vm7, %v1497_v21, %v1489_v51  ;;  %v1939_v26 = vmul.f32 %v1651_v48, %v1651_v48  ;;  %v2990_v7 = vsel %vm146_vm3, %v1072_v42, 0.0  ;;  %v4014_v48 = vrot.slane %v2898_v3, 4 }
  0x9d   :  { %v1472_v4 = vsel %vm362_vm2, %v4011_v17, %v1471_v47  ;;  %v1522_v1 = vrot.slane %v1499_v53, 1  ;;  %v1560_v38 = vrot.slane %v1499_v53, 3  ;;  %v1595_v5 = vmul.f32 2.0, %v1499_v53 }
  0x9e   :  { %v1529_v60 = vrot.slane %v1472_v4, 1  ;;  %v1567_v45 = vrot.slane %v1472_v4, 3  ;;  %v1599_v41 = vmul.f32 2.0, %v1472_v4  ;;  %v1953_v20 = vsel %vm133_vm0, %v1939_v26, 0.0 }
  0x9f   :  { %v1523_v0 = vsel %vm423_vm5, %v1520_v56, %v1522_v1  ;;  %v1561_v27 = vsel %vm462_vm6, %v1558_v36, %v1560_v38  ;;  %1954 = vadd.xlane.f32.xlu1 %v1953_v20  ;;  %v1618_v17 = vrot.slane %v1595_v5, 4  ;;  %v1505_v21 = vmul.f32 -2.0, %v1499_v53 }
  0xa0   :  { %v1530_v16 = vsel %vm423_vm5, %v4012_v22, %v1529_v60  ;;  %v1568_v46 = vsel %vm462_vm6, %v4013_v50, %v1567_v45  ;;  %v1625_v10 = vrot.slane %v1599_v41, 4  ;;  %v1546_v32 = vsub.f32 %v1504_v24, %v1523_v0 }
  0xa1   :  { %v1550_v51 = vsub.f32 %v2923_v13, %v1530_v16  ;;  %v1474_v42 = vsel %vm362_vm2, %v1471_v47, %v1473_v11  ;;  %v1490_v22 = vrot.slane %v784_v62, 4  ;;  %v1509_v50 = vmul.f32 -2.0, %v1472_v4 }
  0xa2   :  { %v1626_v18 = vsel %vm406_vm7, %v4014_v48, %v1625_v10  ;;  %v1584_v26 = vadd.f32 %v1561_v27, %v1546_v32  ;;  %v1619_v13 = vsel %vm406_vm7, %v1616_v44, %v1618_v17  ;;  %v1547_v16 = vsub.f32 %v1505_v21, %v1522_v1 }
  0xa3   :  { %v1588_v41 = vadd.f32 %v1568_v46, %v1550_v51  ;;  %v1498_v56 = vsel %vm403_vm4, %v1474_v42, %v1486_v6  ;;  %v491_v3 = vadd.f32 %v465_v35, %v452_v55  ;;  %v521_v48 = vrot.slane %v2970_v57, 4  ;;  %1086 = vadd.xlane.f32.xlu1 %v1085_v8 }
  0xa4   :  { %v1500_v20 = vsel %vm406_vm7, %v1498_v56, %v1490_v22  ;;  %v1642_v24 = vadd.f32 %v1619_v13, %v1584_v26  ;;  %v1585_v53 = vadd.f32 %v1560_v38, %v1547_v16  ;;  %v4015_v11 = vrot.slane %v2434_v43, 4 }
  0xa5   :  { %v1646_v36 = vadd.f32 %v1626_v18, %v1588_v41  ;;  %v1531_v5 = vrot.slane %v1500_v20, 1  ;;  %v1569_v46 = vrot.slane %v1500_v20, 3  ;;  %v1600_v62 = vmul.f32 2.0, %v1500_v20 }
  0xa6   :  { %v523_v44 = vsel %vm406_vm7, %v521_v48, %v4015_v11  ;;  %v1510_v4 = vmul.f32 -2.0, %v1500_v20  ;;  %v1652_v1 = vmul.f32 0.1, %v1642_v24  ;;  %v1643_v6 = vadd.f32 %v1618_v17, %v1585_v53 }
  0xa7   :  { %v1656_v47 = vmul.f32 0.1, %v1646_v36  ;;  %v1532_v51 = vsel %vm423_vm5, %v1529_v60, %v1531_v5  ;;  %v1570_v55 = vsel %vm462_vm6, %v1567_v45, %v1569_v46  ;;  %v1627_v8 = vrot.slane %v1600_v62, 4 }
  0xa8   :  { %v1551_v57 = vsub.f32 %v1509_v50, %v1532_v51  ;;  %v549_v0 = vadd.f32 %v523_v44, %v491_v3  ;;  %v1940_v38 = vmul.f32 %v1652_v1, %v1652_v1  ;;  %v1653_v27 = vmul.f32 0.1, %v1643_v6 }
  0xa9   :  { %v1944_v35 = vmul.f32 %v1656_v47, %v1656_v47  ;;  %v1552_v18 = vsub.f32 %v1510_v4, %v1531_v5  ;;  %v414_v32 = vmul.f32 -2.0, %v2492_v33  ;;  %v1628_v42 = vsel %vm406_vm7, %v1625_v10, %v1627_v8 }
  0xaa   :  { %v1589_v41 = vadd.f32 %v1570_v55, %v1551_v57  ;;  %v3012_v22 = vmul.f32 0.1, %v549_v0  ;;  %v1956_v60 = vsel %vm133_vm0, %v1940_v38, 0.0  ;;  %v1941_v45 = vmul.f32 %v1653_v27, %v1653_v27 }
  0xab   :  { %v1968_v21 = vsel %vm133_vm0, %v1944_v35, 0.0  ;;  %v1590_v17 = vadd.f32 %v1569_v46, %v1552_v18  ;;  %v433_v50 = vrot.slane %v2492_v33, 1  ;;  %1957 = vadd.xlane.f32.xlu1 %v1956_v60  ;;  %v472_v56 = vrot.slane %v2492_v33, 3 }
  0xac   :  { %1969 = vadd.xlane.f32.xlu0 %v1968_v21  ;;  %v1647_v26 = vadd.f32 %v1628_v42, %v1589_v41  ;;  %v1001_v13 = vmul.f32 %v3012_v22, %v3012_v22  ;;  %v1229_v16 = vrot.slane %v3012_v22, 7  ;;  %v1959_v10 = vsel %vm146_vm3, %v1941_v45, 0.0 }
  0xad   :  { %v1648_v36 = vadd.f32 %v1627_v8, %v1590_v17  ;;  %v4016_v20 = vrot.slane %v2485_v29, 1  ;;  %v506_v48 = vmul.f32 2.0, %v2492_v33  ;;  %v4017_v46 = vrot.slane %v2485_v29, 3 }
  0xae   :  { %v1657_v24 = vmul.f32 0.1, %v1647_v26  ;;  %v1011_v53 = vsel %vm133_vm0, %v1001_v13, 0.0  ;;  %v410_v44 = vmul.f32 -2.0, %v2420_v39  ;;  %v427_v4 = vrot.slane %v2423_v40, 1 }
  0xaf   :  { %v435_v3 = vsel %vm423_vm5, %v433_v50, %v4016_v20  ;;  %v474_v47 = vsel %vm462_vm6, %v472_v56, %v4017_v46  ;;  %v1658_v62 = vmul.f32 0.1, %v1648_v36  ;;  %v530_v11 = vrot.slane %v506_v48, 4  ;;  %1960 = vadd.xlane.f32.xlu1 %v1959_v10 }
  0xb0   :  { %v457_v5 = vsub.f32 %v414_v32, %v435_v3  ;;  %1101 = vadd.xlane.f32.xlu0 %v2990_v7  ;;  %v1945_v1 = vmul.f32 %v1657_v24, %v1657_v24  ;;  %v466_v33 = vrot.slane %v2423_v40, 3  ;;  %v503_v51 = vmul.f32 2.0, %v2423_v40 }
  0xb1   :  { %v1946_v55 = vmul.f32 %v1658_v62, %v1658_v62  ;;  %v4018_v35 = vrot.slane %v2510_v61, 4  ;;  %v4019_v7 = vrot.slane %v2420_v39, 1  ;;  %v1241_v0 = vrot.slane %v3012_v22, 6 }
  0xb2   :  { %v496_v6 = vadd.f32 %v474_v47, %v457_v5  ;;  %v1971_v38 = vsel %vm133_vm0, %v1945_v1, 0.0  ;;  %v4020_v32 = vrot.slane %v2420_v39, 3  ;;  %v524_v42 = vrot.slane %v503_v51, 4 }
  0xb3   :  { %v532_v57 = vsel %vm406_vm7, %v530_v11, %v4018_v35  ;;  %v428_v8 = vsel %vm423_vm5, %v4019_v7, %v427_v4  ;;  %v1974_v41 = vsel %vm146_vm3, %v1946_v55, 0.0  ;;  %v411_v60 = vmul.f32 -2.0, %v2423_v40  ;;  %1012 = vadd.xlane.f32.xlu1 %v1011_v53 }
  0xb4   :  { %v554_v27 = vadd.f32 %v532_v57, %v496_v6  ;;  %v453_v18 = vsub.f32 %v410_v44, %v428_v8  ;;  %v467_v21 = vsel %vm462_vm6, %v4020_v32, %v466_v33  ;;  %1972 = vadd.xlane.f32.xlu0 %v1971_v38  ;;  %v429_v45 = vrot.slane %v2406_v28, 1 }
  0xb5   :  { %v468_v26 = vrot.slane %v2406_v28, 3  ;;  %v3052_v13 = vmul.f32 2.0, %v2406_v28  ;;  %v4021_v39 = vrot.slane %v2434_v43, 4  ;;  %v415_v40 = vmul.f32 -2.0, %v2485_v29 }
  0xb6   :  { %v3048_v17 = vmul.f32 0.1, %v554_v27  ;;  %v492_v50 = vadd.f32 %v467_v21, %v453_v18  ;;  %v430_v10 = vsel %vm423_vm5, %v427_v4, %v429_v45  ;;  %v436_v36 = vrot.slane %v2488_v30, 1 }
  0xb7   :  { %v525_v56 = vsel %vm406_vm7, %v4021_v39, %v524_v42  ;;  %v454_v24 = vsub.f32 %v411_v60, %v430_v10  ;;  %v469_v43 = vsel %vm462_vm6, %v466_v33, %v468_v26  ;;  %v526_v53 = vrot.slane %v3052_v13, 4 }
  0xb8   :  { %v1006_v20 = vmul.f32 %v3048_v17, %v3048_v17  ;;  %v1230_v3 = vrot.slane %v3048_v17, 7  ;;  %v550_v48 = vadd.f32 %v525_v56, %v492_v50  ;;  %1975 = vadd.xlane.f32.xlu0 %v1974_v41  ;;  %v4022_v5 = vrot.slane %v2485_v29, 1 }
  0xb9   :  { %v475_v47 = vrot.slane %v2488_v30, 3  ;;  %v493_v44 = vadd.f32 %v469_v43, %v454_v24  ;;  %v527_v1 = vsel %vm406_vm7, %v524_v42, %v526_v53  ;;  %v4023_v6 = vrot.slane %v2485_v29, 3 }
  0xba   :  { %v437_v46 = vsel %vm423_vm5, %v4022_v5, %v436_v36  ;;  %v1026_v62 = vsel %vm133_vm0, %v1006_v20, 0.0  ;;  %v560_v11 = vmul.f32 0.1, %v550_v48  ;;  %v508_v51 = vmul.f32 2.0, %v2488_v30 }
  0xbb   :  { %v458_v4 = vsub.f32 %v415_v40, %v437_v46  ;;  %1027 = vadd.xlane.f32.xlu1 %v1026_v62  ;;  %v476_v33 = vsel %vm462_vm6, %v4023_v6, %v475_v47  ;;  %v1250_v55 = vrot.slane %v3048_v17, 6  ;;  %v551_v7 = vadd.f32 %v527_v1, %v493_v44 }
  0xbc   :  { %v1002_v35 = vmul.f32 %v560_v11, %v560_v11  ;;  %v1242_v57 = vrot.slane %v560_v11, 6  ;;  %v533_v38 = vrot.slane %v508_v51, 4  ;;  %v1277_v27 = vsel %vm168_vm1, %v3012_v22, %v1229_v16 }
  0xbd   :  { %v497_v8 = vadd.f32 %v476_v33, %v458_v4  ;;  %v416_v18 = vmul.f32 -2.0, %v2488_v30  ;;  %v438_v29 = vrot.slane %v2516_v12, 1  ;;  %v3092_v41 = vmul.f32 0.1, %v551_v7 }
  0xbe   :  { %v1014_v32 = vsel %vm133_vm0, %v1002_v35, 0.0  ;;  %v3090_v21 = vsel %vm362_vm2, %v1241_v0, %v1242_v57  ;;  %v1279_v42 = vsel %vm362_vm2, %v1277_v27, %v1241_v0  ;;  %v4024_v60 = vrot.slane %v2510_v61, 4 }
  0xbf   :  { %1015 = vadd.xlane.f32.xlu0 %v1014_v32  ;;  %v1285_v39 = vmul.f32 -2.0, %v1279_v42  ;;  %v1299_v22 = vrot.slane %v1279_v42, 1  ;;  %v1300_v30 = vrot.slane %v3090_v21, 1  ;;  %v1003_v16 = vmul.f32 %v3092_v41, %v3092_v41 }
  0xc0   :  { %v534_v50 = vsel %vm406_vm7, %v4024_v60, %v533_v38  ;;  %v1244_v56 = vrot.slane %v3092_v41, 6  ;;  %v1337_v40 = vrot.slane %v1279_v42, 3  ;;  %v1338_v20 = vrot.slane %v3090_v21, 3 }
  0xc1   :  { %v555_v10 = vadd.f32 %v534_v50, %v497_v8  ;;  %v1301_v0 = vsel %vm423_vm5, %v1299_v22, %v1300_v30  ;;  %v1375_v61 = vmul.f32 2.0, %v1279_v42  ;;  %v3107_v48 = vmul.f32 2.0, %v3090_v21 }
  0xc2   :  { %v1017_v24 = vsel %vm133_vm0, %v1003_v16, 0.0  ;;  %v3113_v43 = vsel %vm362_vm2, %v1242_v57, %v1244_v56  ;;  %v1327_v46 = vsub.f32 %v1285_v39, %v1301_v0  ;;  %v1339_v62 = vsel %vm462_vm6, %v1337_v40, %v1338_v20 }
  0xc3   :  { %v565_v5 = vmul.f32 0.1, %v555_v10  ;;  %1018 = vadd.xlane.f32.xlu1 %v1017_v24  ;;  %v1395_v11 = vrot.slane %v1375_v61, 4  ;;  %v1396_v44 = vrot.slane %v3107_v48, 4  ;;  %v439_v4 = vsel %vm423_vm5, %v436_v36, %v438_v29 }
  0xc4   :  { %v1365_v33 = vadd.f32 %v1339_v62, %v1327_v46  ;;  %v459_v51 = vsub.f32 %v416_v18, %v439_v4  ;;  %v477_v57 = vrot.slane %v2516_v12, 3  ;;  %v3123_v7 = vmul.f32 2.0, %v2516_v12 }
  0xc5   :  { %v1007_v1 = vmul.f32 %v565_v5, %v565_v5  ;;  %v1251_v6 = vrot.slane %v565_v5, 6  ;;  %v1397_v35 = vsel %vm406_vm7, %v1395_v11, %v1396_v44  ;;  %v1278_v8 = vsel %vm168_vm1, %v3048_v17, %v1230_v3 }
  0xc6   :  { %v1423_v36 = vadd.f32 %v1397_v35, %v1365_v33  ;;  %v1280_v42 = vsel %vm362_vm2, %v1278_v8, %v1250_v55  ;;  %v478_v18 = vsel %vm462_vm6, %v475_v47, %v477_v57  ;;  %v535_v60 = vrot.slane %v3123_v7, 4 }
  0xc7   :  { %v1029_v27 = vsel %vm133_vm0, %v1007_v1, 0.0  ;;  %v3129_v32 = vsel %vm362_vm2, %v1250_v55, %v1251_v6  ;;  %v1290_v50 = vmul.f32 -2.0, %v1280_v42  ;;  %v1308_v39 = vrot.slane %v1280_v42, 1 }
  0xc8   :  { %1030 = vadd.xlane.f32.xlu0 %v1029_v27  ;;  %v1433_v22 = vmul.f32 0.1, %v1423_v36  ;;  %v498_v16 = vadd.f32 %v478_v18, %v459_v51  ;;  %v1309_v17 = vrot.slane %v3129_v32, 1  ;;  %v1346_v3 = vrot.slane %v1280_v42, 3  ;;  %v3153_v51 = vpop.xlane.xlu1 %141 }
  0xc9   :  { %v536_v10 = vsel %vm406_vm7, %v533_v38, %v535_v60  ;;  %v1347_v55 = vrot.slane %v3129_v32, 3  ;;  %v1380_v40 = vmul.f32 2.0, %v1280_v42  ;;  %v3142_v0 = vmul.f32 2.0, %v3129_v32 }
  0xca   :  { %v1875_v47 = vmul.f32 %v1433_v22, %v1433_v22  ;;  %v556_v61 = vadd.f32 %v536_v10, %v498_v16  ;;  %v1310_v48 = vsel %vm423_vm5, %v1308_v39, %v1309_v17  ;;  %v1286_v24 = vmul.f32 -2.0, %v3090_v21 }
  0xcb   :  { %v1332_v5 = vsub.f32 %v1290_v50, %v1310_v48  ;;  %v1348_v46 = vsel %vm462_vm6, %v1346_v3, %v1347_v55  ;;  %v1404_v62 = vrot.slane %v1380_v40, 4  ;;  %v1405_v11 = vrot.slane %v3142_v0, 4  ;;  %v3177_v3 = vpop.xlane.xlu0 %135 }
  0xcc   :  { %v1885_v38 = vsel %vm133_vm0, %v1875_v47, 0.0  ;;  %v3149_v4 = vmul.f32 0.1, %v556_v61  ;;  %v1302_v1 = vrot.slane %v3113_v43, 1  ;;  %v1340_v33 = vrot.slane %v3113_v43, 3 }
  0xcd   :  { %1886 = vadd.xlane.f32.xlu1 %v1885_v38  ;;  %v1370_v35 = vadd.f32 %v1348_v46, %v1332_v5  ;;  %v1406_v8 = vsel %vm406_vm7, %v1404_v62, %v1405_v11  ;;  %v3159_v27 = vmul.f32 2.0, %v3113_v43  ;;  %v4025_v36 = vrot.slane %v2416_v37, 6 }
  0xce   :  { %v4026_v42 = vrot.slane %v2383_v9, 6  ;;  %v1008_v50 = vmul.f32 %v3149_v4, %v3149_v4  ;;  %v1253_v39 = vrot.slane %v3149_v4, 6  ;;  %v1303_v22 = vsel %vm423_vm5, %v1300_v30, %v1302_v1 }
  0xcf   :  { %v1341_v16 = vsel %vm462_vm6, %v1338_v20, %v1340_v33  ;;  %v1428_v9 = vadd.f32 %v1406_v8, %v1370_v35  ;;  %v1328_v10 = vsub.f32 %v1286_v24, %v1303_v22  ;;  %v1398_v40 = vrot.slane %v3159_v27, 4 }
  0xd0   :  { %v371_v18 = vsel %vm362_vm2, %v4026_v42, %v4025_v36  ;;  %v4027_v47 = vrot.slane %v2416_v37, 5  ;;  %v1032_v48 = vsel %vm133_vm0, %v1008_v50, 0.0  ;;  %v3187_v21 = vsel %vm362_vm2, %v1251_v6, %v1253_v39 }
  0xd1   :  { %v4028_v30 = vrot.slane %v2416_v37, 4  ;;  %v412_v5 = vmul.f32 -2.0, %v2406_v28  ;;  %1033 = vadd.xlane.f32.xlu0 %v1032_v48  ;;  %v1438_v24 = vmul.f32 0.1, %v1428_v9  ;;  %v1366_v46 = vadd.f32 %v1341_v16, %v1328_v10  ;;  %v3200_v37 = vpop.xlane.xlu1 %144  ;;  %v3213_v10 = vpop.xlane.xlu0 %138 }
  0xd2   :  { %v404_v61 = vsel %vm403_vm4, %v371_v18, %v4027_v47  ;;  %v1399_v62 = vsel %vm406_vm7, %v1396_v44, %v1398_v40  ;;  %v1291_v6 = vmul.f32 -2.0, %v3129_v32  ;;  %v1311_v36 = vrot.slane %v3187_v21, 1 }
  0xd3   :  { %v407_v20 = vsel %vm406_vm7, %v404_v61, %v4028_v30  ;;  %v1880_v42 = vmul.f32 %v1438_v24, %v1438_v24  ;;  %v1424_v18 = vadd.f32 %v1399_v62, %v1366_v46  ;;  %v1349_v22 = vrot.slane %v3187_v21, 3 }
  0xd4   :  { %v431_v38 = vrot.slane %v407_v20, 1  ;;  %v470_v35 = vrot.slane %v407_v20, 3  ;;  %v3196_v8 = vmul.f32 2.0, %v407_v20  ;;  %v1312_v32 = vsel %vm423_vm5, %v1309_v17, %v1311_v36 }
  0xd5   :  { %v1900_v47 = vsel %vm133_vm0, %v1880_v42, 0.0  ;;  %v1434_v61 = vmul.f32 0.1, %v1424_v18  ;;  %v1333_v48 = vsub.f32 %v1291_v6, %v1312_v32  ;;  %v3223_v30 = vmul.f32 2.0, %v3187_v21 }
  0xd6   :  { %v432_v50 = vsel %vm423_vm5, %v429_v45, %v431_v38  ;;  %v471_v44 = vsel %vm462_vm6, %v468_v26, %v470_v35  ;;  %v528_v9 = vrot.slane %v3196_v8, 4  ;;  %v1350_v45 = vsel %vm462_vm6, %v1347_v55, %v1349_v22  ;;  %1901 = vadd.xlane.f32.xlu1 %v1900_v47  ;;  %v3251_v47 = vpop.xlane.xlu0 %148 }
  0xd7   :  { %v455_v16 = vsub.f32 %v412_v5, %v432_v50  ;;  %v1287_v17 = vmul.f32 -2.0, %v3113_v43  ;;  %v1876_v5 = vmul.f32 %v1434_v61, %v1434_v61  ;;  %v1371_v24 = vadd.f32 %v1350_v45, %v1333_v48 }
  0xd8   :  { %v529_v26 = vsel %vm406_vm7, %v526_v53, %v528_v9  ;;  %v4029_v46 = vrot.slane %v2479_v25, 4  ;;  %v417_v55 = vmul.f32 -2.0, %v2516_v12  ;;  %v1407_v6 = vrot.slane %v3223_v30, 4  ;;  %v3232_v53 = vpop.xlane.xlu1 %151 }
  0xd9   :  { %v494_v28 = vadd.f32 %v471_v44, %v455_v16  ;;  %v1888_v18 = vsel %vm133_vm0, %v1876_v5, 0.0  ;;  %v413_v16 = vmul.f32 -2.0, %v407_v20  ;;  %v3236_v44 = vmul.f32 -2.0, %v3187_v21 }
  0xda   :  { %v408_v62 = vsel %vm406_vm7, %v2524_v23, %v4029_v46  ;;  %1889 = vadd.xlane.f32.xlu0 %v1888_v18  ;;  %v1408_v23 = vsel %vm406_vm7, %v1405_v11, %v1407_v6  ;;  %v4030_v5 = vrot.slane %v2618_v15, 6 }
  0xdb   :  { %v552_v8 = vadd.f32 %v529_v26, %v494_v28  ;;  %v440_v13 = vrot.slane %v408_v62, 1  ;;  %v479_v42 = vrot.slane %v408_v62, 3  ;;  %v510_v50 = vmul.f32 2.0, %v408_v62 }
  0xdc   :  { %v1429_v61 = vadd.f32 %v1408_v23, %v1371_v24  ;;  %v456_v28 = vsub.f32 %v413_v16, %v431_v38  ;;  %v418_v11 = vmul.f32 -2.0, %v408_v62  ;;  %v3285_v16 = vpop.xlane.xlu0 %154 }
  0xdd   :  { %v3238_v25 = vmul.f32 0.1, %v552_v8  ;;  %v441_v32 = vsel %vm423_vm5, %v438_v29, %v440_v13  ;;  %v480_v20 = vsel %vm462_vm6, %v477_v57, %v479_v42  ;;  %v537_v45 = vrot.slane %v510_v50, 4  ;;  %v3275_v8 = vpop.xlane.xlu1 %157 }
  0xde   :  { %v460_v48 = vsub.f32 %v417_v55, %v441_v32  ;;  %v4031_v29 = vrot.slane %v2630_v52, 6  ;;  %v1439_v57 = vmul.f32 0.1, %v1429_v61  ;;  %v495_v38 = vadd.f32 %v470_v35, %v456_v28 }
  0xdf   :  { %v1004_v26 = vmul.f32 %v3238_v25, %v3238_v25  ;;  %v1246_v0 = vrot.slane %v3238_v25, 6  ;;  %v538_v24 = vsel %vm406_vm7, %v535_v60, %v537_v45  ;;  %v461_v15 = vsub.f32 %v418_v11, %v440_v13 }
  0xe0   :  { %v3261_v12 = vsel %vm362_vm2, %v4031_v29, %v4030_v5  ;;  %v499_v46 = vadd.f32 %v480_v20, %v460_v48  ;;  %v3273_v52 = vmul.f32 -2.0, %v2683_v14  ;;  %v1881_v18 = vmul.f32 %v1439_v57, %v1439_v57 }
  0xe1   :  { %v1020_v55 = vsel %vm133_vm0, %v1004_v26, 0.0  ;;  %v3270_v62 = vsel %vm362_vm2, %v1244_v56, %v1246_v0  ;;  %v553_v41 = vadd.f32 %v528_v9, %v495_v38  ;;  %v500_v13 = vadd.f32 %v479_v42, %v461_v15  ;;  %v3301_v57 = vpop.xlane.xlu1 %163 }
  0xe2   :  { %1021 = vadd.xlane.f32.xlu1 %v1020_v55  ;;  %v1304_v7 = vrot.slane %v3270_v62, 1  ;;  %v1342_v60 = vrot.slane %v3270_v62, 3  ;;  %v3280_v35 = vmul.f32 2.0, %v3270_v62  ;;  %v557_v50 = vadd.f32 %v538_v24, %v499_v46 }
  0xe3   :  { %v3283_v56 = vmul.f32 -2.0, %v3270_v62  ;;  %v1903_v25 = vsel %vm133_vm0, %v1881_v18, 0.0  ;;  %v563_v48 = vmul.f32 0.1, %v553_v41  ;;  %v558_v28 = vadd.f32 %v537_v45, %v500_v13  ;;  %v3310_v62 = vpop.xlane.xlu0 %160 }
  0xe4   :  { %v1305_v23 = vsel %vm423_vm5, %v1302_v1, %v1304_v7  ;;  %v1343_v32 = vsel %vm462_vm6, %v1340_v33, %v1342_v60  ;;  %v1400_v20 = vrot.slane %v3280_v35, 4  ;;  %1904 = vadd.xlane.f32.xlu0 %v1903_v25  ;;  %v567_v61 = vmul.f32 0.1, %v557_v50 }
  0xe5   :  { %v1329_v9 = vsub.f32 %v1287_v17, %v1305_v23  ;;  %v857_v26 = vrot.slane %v2683_v14, 1  ;;  %v858_v11 = vrot.slane %v3261_v12, 1  ;;  %v895_v1 = vrot.slane %v2683_v14, 3 }
  0xe6   :  { %v1401_v42 = vsel %vm406_vm7, %v1398_v40, %v1400_v20  ;;  %v1009_v5 = vmul.f32 %v567_v61, %v567_v61  ;;  %v1255_v33 = vrot.slane %v567_v61, 6  ;;  %v1005_v29 = vmul.f32 %v563_v48, %v563_v48 }
  0xe7   :  { %v1367_v43 = vadd.f32 %v1343_v32, %v1329_v9  ;;  %v1248_v17 = vrot.slane %v563_v48, 6  ;;  %v1269_v46 = vrot.slane %v563_v48, 5  ;;  %v1273_v24 = vrot.slane %v563_v48, 4 }
  0xe8   :  { %v568_v45 = vmul.f32 0.1, %v558_v28  ;;  %v1035_v27 = vsel %vm133_vm0, %v1009_v5, 0.0  ;;  %v3307_v40 = vsel %vm362_vm2, %v1253_v39, %v1255_v33  ;;  %v1023_v55 = vsel %vm146_vm3, %v1005_v29, 0.0 }
  0xe9   :  { %v1425_v38 = vadd.f32 %v1401_v42, %v1367_v43  ;;  %1036 = vadd.xlane.f32.xlu0 %v1035_v27  ;;  %v1313_v15 = vrot.slane %v3307_v40, 1  ;;  %v1351_v18 = vrot.slane %v3307_v40, 3  ;;  %v3315_v35 = vmul.f32 2.0, %v3307_v40  ;;  %v3328_v42 = vpop.xlane.xlu1 %202 }
  0xea   :  { %v1249_v50 = vsel %vm362_vm2, %v1246_v0, %v1248_v17  ;;  %v1010_v13 = vmul.f32 %v568_v45, %v568_v45  ;;  %v1257_v39 = vrot.slane %v568_v45, 6  ;;  %v1270_v5 = vrot.slane %v568_v45, 5 }
  0xeb   :  { %v1435_v41 = vmul.f32 0.1, %v1425_v38  ;;  %v1281_v4 = vsel %vm403_vm4, %v1249_v50, %v1269_v46  ;;  %v1314_v25 = vsel %vm423_vm5, %v1311_v36, %v1313_v15  ;;  %v1352_v23 = vsel %vm462_vm6, %v1349_v22, %v1351_v18 }
  0xec   :  { %v1409_v32 = vrot.slane %v3315_v35, 4  ;;  %v1283_v9 = vsel %vm406_vm7, %v1281_v4, %v1273_v24  ;;  %v1334_v0 = vsub.f32 %v3236_v44, %v1314_v25  ;;  %v1038_v21 = vsel %vm146_vm3, %v1010_v13, 0.0  ;;  %v3337_v44 = vpop.xlane.xlu0 %199 }
  0xed   :  { %v1877_v61 = vmul.f32 %v1435_v41, %v1435_v41  ;;  %v1306_v48 = vrot.slane %v1283_v9, 1  ;;  %v1344_v28 = vrot.slane %v1283_v9, 3  ;;  %v1379_v36 = vmul.f32 2.0, %v1283_v9 }
  0xee   :  { %v1410_v43 = vsel %vm406_vm7, %v1407_v6, %v1409_v32  ;;  %v1372_v29 = vadd.f32 %v1352_v23, %v1334_v0  ;;  %v1289_v30 = vmul.f32 -2.0, %v1283_v9  ;;  %v1258_v6 = vsel %vm362_vm2, %v1255_v33, %v1257_v39 }
  0xef   :  { %v1891_v22 = vsel %vm133_vm0, %v1877_v61, 0.0  ;;  %v1307_v17 = vsel %vm423_vm5, %v1304_v7, %v1306_v48  ;;  %v1345_v46 = vsel %vm462_vm6, %v1342_v60, %v1344_v28  ;;  %v1402_v38 = vrot.slane %v1379_v36, 4 }
  0xf0   :  { %1892 = vadd.xlane.f32.xlu1 %v1891_v22  ;;  %v1330_v24 = vsub.f32 %v3283_v56, %v1307_v17  ;;  %v1430_v27 = vadd.f32 %v1410_v43, %v1372_v29  ;;  %v1274_v35 = vrot.slane %v568_v45, 4  ;;  %v1282_v50 = vsel %vm403_vm4, %v1258_v6, %v1270_v5  ;;  %v3350_v45 = vpop.xlane.xlu1 %208  ;;  %v3356_v43 = vpop.xlane.xlu0 %205 }
  0xf1   :  { %v1293_v41 = vmul.f32 -2.0, %v3307_v40  ;;  %v1403_v7 = vsel %vm406_vm7, %v1400_v20, %v1402_v38  ;;  %v1331_v13 = vsub.f32 %v1289_v30, %v1306_v48  ;;  %v859_v60 = vsel %vm423_vm5, %v857_v26, %v858_v11 }
  0xf2   :  { %v1368_v4 = vadd.f32 %v1345_v46, %v1330_v24  ;;  %v1440_v25 = vmul.f32 0.1, %v1430_v27  ;;  %v1284_v56 = vsel %vm406_vm7, %v1282_v50, %v1274_v35  ;;  %v885_v23 = vsub.f32 %v3273_v52, %v859_v60 }
  0xf3   :  { %v896_v33 = vrot.slane %v3261_v12, 3  ;;  %v1369_v40 = vadd.f32 %v1344_v28, %v1331_v13  ;;  %v1315_v9 = vrot.slane %v1284_v56, 1  ;;  %v1353_v61 = vrot.slane %v1284_v56, 3 }
  0xf4   :  { %1024 = vadd.xlane.f32.xlu1 %v1023_v55  ;;  %v1426_v39 = vadd.f32 %v1403_v7, %v1368_v4  ;;  %v1882_v20 = vmul.f32 %v1440_v25, %v1440_v25  ;;  %v1384_v0 = vmul.f32 2.0, %v1284_v56  ;;  %v933_v48 = vmul.f32 2.0, %v2683_v14  ;;  %v3370_v25 = vpop.xlane.xlu0 %211 }
  0xf5   :  { %v897_v26 = vsel %vm462_vm6, %v895_v1, %v896_v33  ;;  %v1427_v36 = vadd.f32 %v1402_v38, %v1369_v40  ;;  %v1316_v5 = vsel %vm423_vm5, %v1313_v15, %v1315_v9  ;;  %v1354_v55 = vsel %vm462_vm6, %v1351_v18, %v1353_v61  ;;  %v3364_v15 = vpop.xlane.xlu1 %214 }
  0xf6   :  { %v1436_v52 = vmul.f32 0.1, %v1426_v39  ;;  %v1906_v28 = vsel %vm133_vm0, %v1882_v20, 0.0  ;;  %v1335_v22 = vsub.f32 %v1293_v41, %v1316_v5  ;;  %v1411_v29 = vrot.slane %v1384_v0, 4 }
  0xf7   :  { %v923_v17 = vadd.f32 %v897_v26, %v885_v23  ;;  %1907 = vadd.xlane.f32.xlu0 %v1906_v28  ;;  %v1437_v24 = vmul.f32 0.1, %v1427_v36  ;;  %v934_v1 = vmul.f32 2.0, %v3261_v12  ;;  %v953_v30 = vrot.slane %v933_v48, 4 }
  0xf8   :  { %v1878_v46 = vmul.f32 %v1436_v52, %v1436_v52  ;;  %v1373_v14 = vadd.f32 %v1354_v55, %v1335_v22  ;;  %v1412_v6 = vsel %vm406_vm7, %v1409_v32, %v1411_v29  ;;  %v1294_v27 = vmul.f32 -2.0, %v1284_v56 }
  0xf9   :  { %v848_v38 = vmul.f32 -2.0, %v2695_v59  ;;  %v1879_v35 = vmul.f32 %v1437_v24, %v1437_v24  ;;  %v954_v50 = vrot.slane %v934_v1, 4  ;;  %v866_v41 = vrot.slane %v2695_v59, 1 }
  0xfa   :  { %v1894_v18 = vsel %vm133_vm0, %v1878_v46, 0.0  ;;  %v1431_v4 = vadd.f32 %v1412_v6, %v1373_v14  ;;  %v1336_v7 = vsub.f32 %v1294_v27, %v1315_v9  ;;  %v904_v13 = vrot.slane %v2695_v59, 3  ;;  %v3383_v46 = vpop.xlane.xlu1 %220 }
  0xfb   :  { %1895 = vadd.xlane.f32.xlu1 %v1894_v18  ;;  %v938_v60 = vmul.f32 2.0, %v2695_v59  ;;  %1039 = vadd.xlane.f32.xlu0 %v1038_v21  ;;  %v1897_v32 = vsel %vm146_vm3, %v1879_v35, 0.0  ;;  %v955_v56 = vsel %vm406_vm7, %v953_v30, %v954_v50  ;;  %v4032_v23 = vrot.slane %v2705_v49, 1 }
  0xfc   :  { %v844_v40 = vmul.f32 -2.0, %v3261_v12  ;;  %v1441_v20 = vmul.f32 0.1, %v1431_v4  ;;  %v981_v0 = vadd.f32 %v955_v56, %v923_v17  ;;  %v1374_v9 = vadd.f32 %v1353_v61, %v1336_v7  ;;  %v2224_v7 = vld [vmem:[#allocation5 + $0x38] sm:$0xff] }
  0xfd   :  { %v868_v39 = vsel %vm423_vm5, %v866_v41, %v4032_v23  ;;  %v4033_v48 = vrot.slane %v2705_v49, 3  ;;  %v962_v52 = vrot.slane %v938_v60, 4  ;;  %v860_v21 = vrot.slane %v2656_v2, 1 }
  0xfe   :  { %v890_v26 = vsub.f32 %v848_v38, %v868_v39  ;;  %v898_v36 = vrot.slane %v2656_v2, 3  ;;  %v1883_v5 = vmul.f32 %v1441_v20, %v1441_v20  ;;  %v991_v55 = vmul.f32 0.1, %v981_v0 }
  0xff   :  { %v906_v59 = vsel %vm462_vm6, %v904_v13, %v4033_v48  ;;  %1898 = vadd.xlane.f32.xlu1 %v1897_v32  ;;  %v1432_v28 = vadd.f32 %v1411_v29, %v1374_v9  ;;  %v4034_v17 = vrot.slane %v2710_v31, 4  ;;  %v861_v24 = vsel %vm423_vm5, %v858_v11, %v860_v21  ;;  %v3394_v29 = vpop.xlane.xlu0 %217 }
 0x100   :  { %v928_v22 = vadd.f32 %v906_v59, %v890_v26  ;;  %v899_v1 = vsel %vm462_vm6, %v896_v33, %v898_v36  ;;  %v935_v30 = vmul.f32 2.0, %v2656_v2  ;;  %v1909_v14 = vsel %vm133_vm0, %v1883_v5, 0.0 }
 0x101   :  { %v964_v61 = vsel %vm406_vm7, %v962_v52, %v4034_v17  ;;  %v1161_v6 = vand.u32 2147483647, %v991_v55  ;;  %v1442_v27 = vmul.f32 0.1, %v1432_v28  ;;  %1910 = vadd.xlane.f32.xlu0 %v1909_v14  ;;  %v886_v18 = vsub.f32 %v844_v40, %v861_v24  ;;  %v3404_v40 = vpop.xlane.xlu1 %226 }
 0x102   :  { %v986_v38 = vadd.f32 %v964_v61, %v928_v22  ;;  %v956_v35 = vrot.slane %v935_v30, 4  ;;  %v1661_v4 = vrot.slane %v991_v55, 7  ;;  %2186 = vlog2.f32 %v2224_v7 }
 0x103   :  { %v1171_v41 = vsel %vm133_vm0, %v1161_v6, 0.0  ;;  %v1884_v12 = vmul.f32 %v1442_v27, %v1442_v27  ;;  %v924_v33 = vadd.f32 %v899_v1, %v886_v18  ;;  %v1673_v60 = vrot.slane %v991_v55, 6  ;;  %v3419_v59 = vpop.xlane.xlu0 %223 }
 0x104   :  { %1172 = vadd.xlane.f32.xlu1 %v1171_v41  ;;  %v3397_v11 = vmul.f32 0.1, %v986_v38  ;;  %v957_v13 = vsel %vm406_vm7, %v954_v50, %v956_v35  ;;  %v845_v56 = vmul.f32 -2.0, %v2656_v2  ;;  %v862_v23 = vrot.slane %v2661_v19, 1 }
 0x105   :  { %v1912_v32 = vsel %vm146_vm3, %v1884_v12, 0.0  ;;  %v3971_v39 = vrot.slane %v2661_v19, 3  ;;  %v982_v0 = vadd.f32 %v957_v13, %v924_v33  ;;  %v108_v9 = vmul.f32 0.6931472, %v2536_v58  ;;  %v3431_v6 = vpop.xlane.xlu1 %298 }
 0x106   :  { %1913 = vadd.xlane.f32.xlu0 %v1912_v32  ;;  %v1166_v20 = vand.u32 2147483647, %v3397_v11  ;;  %v863_v50 = vsel %vm423_vm5, %v860_v21, %v862_v23  ;;  %v3415_v26 = vmul.f32 2.0, %v2661_v19  ;;  %v165_v48 = vadd.f32 %v3213_v10, %v3177_v3 }
 0x107   :  { %v901_v2 = vsel %vm462_vm6, %v898_v36, %v3971_v39  ;;  %v992_v5 = vmul.f32 0.1, %v982_v0  ;;  %v887_v58 = vsub.f32 %v845_v56, %v863_v50  ;;  %v1709_v28 = vsel %vm168_vm1, %v991_v55, %v1661_v4 }
 0x108   :  { %v1186_v52 = vsel %vm133_vm0, %v1166_v20, 0.0  ;;  %v3970_v21 = vrot.slane %v3415_v26, 4  ;;  %v166_v22 = vadd.f32 %v165_v48, %v3153_v51  ;;  %v1711_v36 = vsel %vm362_vm2, %v1709_v28, %v1673_v60 }
 0x109   :  { %1187 = vadd.xlane.f32.xlu1 %v1186_v52  ;;  %v169_v17 = vsel %vm168_vm1, %v3251_v47, 0.0  ;;  %v1162_v61 = vand.u32 2147483647, %v992_v5  ;;  %v1674_v3 = vrot.slane %v992_v5, 6  ;;  %v925_v10 = vadd.f32 %v901_v2, %v887_v58 }
 0x10a   :  { %v1717_v24 = vmul.f32 -2.0, %v1711_v36  ;;  %v959_v1 = vsel %vm406_vm7, %v956_v35, %v3970_v21  ;;  %v1731_v30 = vrot.slane %v1711_v36, 1  ;;  %v1769_v55 = vrot.slane %v1711_v36, 3  ;;  %v3437_v35 = vpop.xlane.xlu0 %295 }
 0x10b   :  { %v1807_v14 = vmul.f32 2.0, %v1711_v36  ;;  %v1174_v51 = vsel %vm133_vm0, %v1162_v61, 0.0  ;;  %v1675_v27 = vsel %vm362_vm2, %v1673_v60, %v1674_v3  ;;  %v983_v38 = vadd.f32 %v959_v1, %v925_v10 }
 0x10c   :  { %v167_v47 = vadd.f32 %v166_v22, %v3200_v37  ;;  %v2187_v18 = vpop.eup %2186  ;;  %v1662_v41 = vrot.slane %v3397_v11, 7  ;;  %1175 = vadd.xlane.f32.xlu0 %v1174_v51  ;;  %v1732_v4 = vrot.slane %v1675_v27, 1  ;;  %v1770_v12 = vrot.slane %v1675_v27, 3  ;;  %v3450_v22 = vpop.xlane.xlu1 %304 }
 0x10d   :  { %v1808_v7 = vmul.f32 2.0, %v1675_v27  ;;  %v88_v33 = vmul.f32 0.6931472, %v2187_v18  ;;  %v3439_v13 = vmul.f32 0.1, %v983_v38  ;;  %v1827_v32 = vrot.slane %v1807_v14, 4 }
 0x10e   :  { %v3441_v56 = vadd.f32 %v169_v17, %v167_v47  ;;  %v1733_v60 = vsel %vm423_vm5, %v1731_v30, %v1732_v4  ;;  %v1771_v37 = vsel %vm462_vm6, %v1769_v55, %v1770_v12  ;;  %v806_v0 = vrot.slane %v2667_v34, 6  ;;  %4035 = vst [vmem:[#allocation17_spill] sm:$0xff] %v3450_v22  ;;  %v3462_v55 = vpop.xlane.xlu0 %301 }
 0x10f   :  { %v1828_v20 = vrot.slane %v1808_v7, 4  ;;  %v120_v50 = vsub.f32 %v88_v33, %v108_v9  ;;  %v3962_v2 = vrot.slane %v3439_v13, 6  ;;  %v1759_v48 = vsub.f32 %v1717_v24, %v1733_v60  ;;  %4036 = vst [vmem:[#allocation18_spill] sm:$0xff] %v3462_v55 }
 0x110   :  { %v849_v52 = vmul.f32 -2.0, %v2705_v49  ;;  %v1682_v5 = vrot.slane %v3397_v11, 6  ;;  %v1718_v58 = vmul.f32 -2.0, %v1675_v27  ;;  %v1710_v9 = vsel %vm168_vm1, %v3397_v11, %v1662_v41 }
 0x111   :  { %v1829_v28 = vsel %vm406_vm7, %v1827_v32, %v1828_v20  ;;  %v291_v36 = vand.u32 2147483647, %v120_v50  ;;  %v811_v17 = vrot.slane %v120_v50, 6  ;;  %v3455_v61 = vsel %vm362_vm2, %v1674_v3, %v3962_v2 }
 0x112   :  { %v1163_v10 = vand.u32 2147483647, %v3439_v13  ;;  %v3963_v24 = vrot.slane %v3455_v61, 1  ;;  %v3967_v1 = vrot.slane %v3455_v61, 3  ;;  %v1797_v30 = vadd.f32 %v1771_v37, %v1759_v48 }
 0x113   :  { %v315_v14 = vsel %vm133_vm0, %v291_v36, 0.0  ;;  %v4037_v51 = vrot.slane %v2676_v54, 6  ;;  %v4038_v3 = vrot.slane %v2578_v63, 6  ;;  %v3474_v47 = vmul.f32 2.0, %v3455_v61 }
 0x114   :  { %316 = vadd.xlane.f32.xlu1 %v315_v14  ;;  %v1735_v37 = vsel %vm423_vm5, %v1732_v4, %v3963_v24  ;;  %v4039_v50 = vrot.slane %v2705_v49, 1  ;;  %v4040_v36 = vrot.slane %v2705_v49, 3 }
 0x115   :  { %v812_v27 = vsel %vm362_vm2, %v4037_v51, %v811_v17  ;;  %v3471_v38 = vsel %vm362_vm2, %v811_v17, %v4038_v3  ;;  %v1760_v51 = vsub.f32 %v1718_v58, %v1735_v37  ;;  %v1773_v58 = vsel %vm462_vm6, %v1770_v12, %v3967_v1 }
 0x116   :  { %v869_v18 = vrot.slane %v812_v27, 1  ;;  %v907_v41 = vrot.slane %v812_v27, 3  ;;  %v940_v7 = vmul.f32 2.0, %v812_v27  ;;  %v850_v33 = vmul.f32 -2.0, %v812_v27  ;;  %v3490_v27 = vpop.xlane.xlu1 %310 }
 0x117   :  { %v3969_v32 = vrot.slane %v3471_v38, 1  ;;  %v3964_v60 = vrot.slane %v3471_v38, 3  ;;  %v3479_v54 = vmul.f32 2.0, %v3471_v38  ;;  %v1798_v37 = vadd.f32 %v1773_v58, %v1760_v51 }
 0x118   :  { %v870_v48 = vsel %vm423_vm5, %v4039_v50, %v869_v18  ;;  %v908_v17 = vsel %vm462_vm6, %v4040_v36, %v907_v41  ;;  %v965_v14 = vrot.slane %v940_v7, 4  ;;  %v4041_v50 = vrot.slane %v2710_v31, 4  ;;  %v3506_v7 = vpop.xlane.xlu0 %307 }
 0x119   :  { %v891_v3 = vsub.f32 %v849_v52, %v870_v48  ;;  %v872_v2 = vsel %vm423_vm5, %v869_v18, %v3969_v32  ;;  %v910_v4 = vsel %vm462_vm6, %v907_v41, %v3964_v60  ;;  %v3968_v24 = vrot.slane %v3479_v54, 4  ;;  %4042 = vst [vmem:[#allocation19_spill] sm:$0xff] %v3506_v7 }
 0x11a   :  { %v966_v49 = vsel %vm406_vm7, %v4041_v50, %v965_v14  ;;  %v892_v36 = vsub.f32 %v850_v33, %v872_v2  ;;  %v3965_v52 = vrot.slane %v3474_v47, 4  ;;  %v1855_v48 = vadd.f32 %v1829_v28, %v1797_v30  ;;  %v3520_v28 = vpop.xlane.xlu1 %1074 }
 0x11b   :  { %v929_v18 = vadd.f32 %v908_v17, %v891_v3  ;;  %v968_v41 = vsel %vm406_vm7, %v965_v14, %v3968_v24  ;;  %v827_v31 = vrot.slane %v2667_v34, 5  ;;  %v1712_v50 = vsel %vm362_vm2, %v1710_v9, %v1682_v5 }
 0x11c   :  { %v930_v60 = vadd.f32 %v910_v4, %v892_v36  ;;  %v1831_v2 = vsel %vm406_vm7, %v1828_v20, %v3965_v52  ;;  %v831_v17 = vrot.slane %v2667_v34, 4  ;;  %v1177_v14 = vsel %vm133_vm0, %v1163_v10, 0.0  ;;  %v4043_v20 = vld [vmem:[#allocation16_spill] sm:$0xff] }
 0x11d   :  { %v987_v33 = vadd.f32 %v966_v49, %v929_v18  ;;  %v1856_v12 = vadd.f32 %v1831_v2, %v1798_v37  ;;  %v1865_v51 = vmul.f32 0.1, %v1855_v48  ;;  %v1812_v36 = vmul.f32 2.0, %v1712_v50 }
 0x11e   :  { %v988_v3 = vadd.f32 %v968_v41, %v930_v60  ;;  %v4044_v49 = vrot.slane %v4043_v20, 6  ;;  %v1722_v9 = vmul.f32 -2.0, %v1712_v50  ;;  %v1740_v37 = vrot.slane %v1712_v50, 1  ;;  %v3530_v41 = vpop.xlane.xlu0 %313 }
 0x11f   :  { %v997_v30 = vmul.f32 0.1, %v987_v33  ;;  %v1866_v4 = vmul.f32 0.1, %v1856_v12  ;;  %4045 = vst [vmem:[#allocation16_spill] sm:$0xff] %v3530_v41  ;;  %v1778_v33 = vrot.slane %v1712_v50, 3 }
 0x120   :  { %v807_v58 = vsel %vm362_vm2, %v4044_v49, %v806_v0  ;;  %v3527_v18 = vmul.f32 0.1, %v988_v3  ;;  %v2035_v52 = vand.u32 2147483647, %v1865_v51  ;;  %v1836_v49 = vrot.slane %v1812_v36, 4 }
 0x121   :  { %v839_v60 = vsel %vm403_vm4, %v807_v58, %v827_v31  ;;  %v1167_v10 = vand.u32 2147483647, %v997_v30  ;;  %v1683_v48 = vrot.slane %v997_v30, 6  ;;  %v2036_v2 = vand.u32 2147483647, %v1866_v4  ;;  %v3549_v4 = vpop.xlane.xlu1 %1089 }
 0x122   :  { %v1168_v12 = vand.u32 2147483647, %v3527_v18  ;;  %v3966_v34 = vrot.slane %v3527_v18, 6  ;;  %v3535_v20 = vsel %vm406_vm7, %v839_v60, %v831_v17  ;;  %v846_v17 = vmul.f32 -2.0, %v2661_v19 }
 0x123   :  { %v1189_v0 = vsel %vm133_vm0, %v1167_v10, 0.0  ;;  %v1684_v31 = vsel %vm362_vm2, %v1682_v5, %v1683_v48  ;;  %v2048_v3 = vsel %vm133_vm0, %v2036_v2, 0.0  ;;  %v864_v2 = vrot.slane %v3535_v20, 1 }
 0x124   :  { %1190 = vadd.xlane.f32.xlu0 %v1189_v0  ;;  %v1192_v50 = vsel %vm133_vm0, %v1168_v12, 0.0  ;;  %v3546_v30 = vsel %vm362_vm2, %v1683_v48, %v3966_v34  ;;  %v1723_v51 = vmul.f32 -2.0, %v1684_v31  ;;  %v1741_v11 = vrot.slane %v1684_v31, 1  ;;  %v3558_v12 = vpop.xlane.xlu0 %1077 }
 0x125   :  { %1193 = vadd.xlane.f32.xlu1 %v1192_v50  ;;  %v3972_v5 = vrot.slane %v3546_v30, 1  ;;  %v1779_v58 = vrot.slane %v1684_v31, 3  ;;  %v3974_v36 = vrot.slane %v3546_v30, 3  ;;  %v1813_v60 = vmul.f32 2.0, %v1684_v31 }
 0x126   :  { %v3554_v10 = vmul.f32 2.0, %v3546_v30  ;;  %v3978_v48 = vrot.slane %v3535_v20, 3  ;;  %v1742_v34 = vsel %vm423_vm5, %v1740_v37, %v1741_v11  ;;  %v2045_v39 = vsel %vm133_vm0, %v2035_v52, 0.0 }
 0x127   :  { %v1744_v0 = vsel %vm423_vm5, %v1741_v11, %v3972_v5  ;;  %v1782_v50 = vsel %vm462_vm6, %v1779_v58, %v3974_v36  ;;  %v1780_v31 = vsel %vm462_vm6, %v1778_v33, %v1779_v58  ;;  %v1837_v24 = vrot.slane %v1813_v60, 4 }
 0x128   :  { %1178 = vadd.xlane.f32.xlu0 %v1177_v14  ;;  %v1765_v1 = vsub.f32 %v1723_v51, %v1744_v0  ;;  %v3973_v32 = vrot.slane %v3554_v10, 4  ;;  %v1764_v21 = vsub.f32 %v1722_v9, %v1742_v34  ;;  %v865_v5 = vsel %vm423_vm5, %v862_v23, %v864_v2  ;;  %v3590_v60 = vpop.xlane.xlu0 %1092 }
 0x129   :  { %2049 = vadd.xlane.f32.xlu1 %v2048_v3  ;;  %v4046_v37 = vrot.slane %v2661_v19, 3  ;;  %v3581_v33 = vmul.f32 2.0, %v3535_v20  ;;  %v1838_v34 = vsel %vm406_vm7, %v1836_v49, %v1837_v24  ;;  %v3587_v3 = vpop.xlane.xlu1 %1080  ;;  %v888_v23 = vsub.f32 %v846_v17, %v865_v5 }
 0x12a   :  { %v1803_v51 = vadd.f32 %v1782_v50, %v1765_v1  ;;  %v1840_v52 = vsel %vm406_vm7, %v1837_v24, %v3973_v32  ;;  %v1802_v9 = vadd.f32 %v1780_v31, %v1764_v21  ;;  %v4047_v1 = vrot.slane %v3415_v26, 4  ;;  %v4048_v21 = vld [vmem:[#allocation14_spill] sm:$0xff] }
 0x12b   :  { %v903_v14 = vsel %vm462_vm6, %v4046_v37, %v3978_v48  ;;  %v3976_v11 = vrot.slane %v3581_v33, 4  ;;  %v828_v31 = vrot.slane %v4048_v21, 5  ;;  %v832_v24 = vrot.slane %v4048_v21, 4  ;;  %v4049_v37 = vld [vmem:[#allocation15_spill] sm:$0xff] }
 0x12c   :  { %2046 = vadd.xlane.f32.xlu0 %v2045_v39  ;;  %v1861_v19 = vadd.f32 %v1840_v52, %v1803_v51  ;;  %v1860_v58 = vadd.f32 %v1838_v34, %v1802_v9  ;;  %v926_v0 = vadd.f32 %v903_v14, %v888_v23  ;;  %v292_v39 = vand.u32 2147483647, %v2578_v63 }
 0x12d   :  { %v961_v50 = vsel %vm406_vm7, %v4047_v1, %v3976_v11  ;;  %v840_v51 = vsel %vm403_vm4, %v4049_v37, %v828_v31  ;;  %v851_v26 = vmul.f32 -2.0, %v3471_v38  ;;  %v3604_v34 = vpop.xlane.xlu1 %1948  ;;  %v1719_v36 = vmul.f32 -2.0, %v3455_v61 }
 0x12e   :  { %v1871_v49 = vmul.f32 0.1, %v1861_v19  ;;  %v1870_v17 = vmul.f32 0.1, %v1860_v58  ;;  %v984_v5 = vadd.f32 %v961_v50, %v926_v0  ;;  %v842_v9 = vsel %vm406_vm7, %v840_v51, %v832_v24  ;;  %v3610_v0 = vpop.xlane.xlu0 %1095 }
 0x12f   :  { %v873_v1 = vrot.slane %v842_v9, 1  ;;  %v911_v32 = vrot.slane %v842_v9, 3  ;;  %v942_v19 = vmul.f32 2.0, %v842_v9  ;;  %v4050_v24 = vrot.slane %v3471_v38, 1 }
 0x130   :  { %v2041_v52 = vand.u32 2147483647, %v1871_v49  ;;  %v2040_v14 = vand.u32 2147483647, %v1870_v17  ;;  %v3606_v23 = vmul.f32 0.1, %v984_v5 }
 0x131   :  { %v874_v49 = vsel %vm423_vm5, %v4050_v24, %v873_v1  ;;  %v4051_v17 = vrot.slane %v3471_v38, 3  ;;  %v318_v37 = vsel %vm133_vm0, %v292_v39, 0.0  ;;  %v852_v24 = vmul.f32 -2.0, %v842_v9 }
 0x132   :  { %v2063_v58 = vsel %vm133_vm0, %v2041_v52, 0.0  ;;  %v2060_v63 = vsel %vm133_vm0, %v2040_v14, 0.0  ;;  %v1164_v50 = vand.u32 2147483647, %v3606_v23  ;;  %v3975_v31 = vrot.slane %v3606_v23, 6 }
 0x133   :  { %2064 = vadd.xlane.f32.xlu1 %v2063_v58  ;;  %2061 = vadd.xlane.f32.xlu0 %v2060_v63  ;;  %v912_v5 = vsel %vm462_vm6, %v4051_v17, %v911_v32  ;;  %v893_v51 = vsub.f32 %v851_v26, %v874_v49  ;;  %v969_v52 = vrot.slane %v942_v19, 4  ;;  %v4052_v58 = vrot.slane %v3439_v13, 6  ;;  %v3635_v26 = vpop.xlane.xlu1 %1963 }
 0x134   :  { %v1180_v14 = vsel %vm133_vm0, %v1164_v50, 0.0  ;;  %v4053_v13 = vrot.slane %v3479_v54, 4  ;;  %v847_v49 = vmul.f32 -2.0, %v3535_v20  ;;  %v4054_v9 = vrot.slane %v3455_v61, 1 }
 0x135   :  { %v3627_v63 = vsel %vm362_vm2, %v4052_v58, %v3975_v31  ;;  %v931_v19 = vadd.f32 %v912_v5, %v893_v51  ;;  %v4055_v31 = vrot.slane %v3455_v61, 3 }
 0x136   :  { %v3977_v38 = vrot.slane %v3627_v63, 1  ;;  %v3979_v17 = vrot.slane %v3627_v63, 3  ;;  %v3633_v39 = vmul.f32 2.0, %v3627_v63  ;;  %v970_v50 = vsel %vm406_vm7, %v4053_v13, %v969_v52 }
 0x137   :  { %1181 = vadd.xlane.f32.xlu1 %v1180_v14  ;;  %319 = vadd.xlane.f32.xlu0 %v318_v37  ;;  %v3652_v37 = vpop.xlane.xlu0 %1951  ;;  %v989_v51 = vadd.f32 %v970_v50, %v931_v19  ;;  %v894_v13 = vsub.f32 %v852_v24, %v873_v1  ;;  %v889_v11 = vsub.f32 %v847_v49, %v864_v2  ;;  %v3663_v22 = vpop.xlane.xlu1 %1083  ;;  %v293_v2 = vand.u32 2147483647, %v4048_v21 }
 0x138   :  { %v1737_v58 = vsel %vm423_vm5, %v4054_v9, %v3977_v38  ;;  %v1775_v14 = vsel %vm462_vm6, %v4055_v31, %v3979_v17  ;;  %v3980_v5 = vrot.slane %v3633_v39, 4  ;;  %v4056_v9 = vrot.slane %v3474_v47, 4 }
 0x139   :  { %v1761_v54 = vsub.f32 %v1719_v36, %v1737_v58  ;;  %v999_v61 = vmul.f32 0.1, %v989_v51  ;;  %v932_v7 = vadd.f32 %v911_v32, %v894_v13  ;;  %v4057_v31 = vrot.slane %v3535_v20, 3 }
 0x13a   :  { %v1833_v38 = vsel %vm406_vm7, %v4056_v9, %v3980_v5  ;;  %v1724_v50 = vmul.f32 -2.0, %v3546_v30  ;;  %v4058_v47 = vrot.slane %v3581_v33, 4  ;;  %v4059_v20 = vrot.slane %v3527_v18, 6 }
 0x13b   :  { %v1799_v48 = vadd.f32 %v1775_v14, %v1761_v54  ;;  %v927_v17 = vadd.f32 %v4057_v31, %v889_v11  ;;  %v1169_v19 = vand.u32 2147483647, %v999_v61  ;;  %v1687_v1 = vrot.slane %v999_v61, 6  ;;  %v3669_v58 = vpop.xlane.xlu0 %1966  ;;  %v3681_v31 = vpop.xlane.xlu1 %1954 }
 0x13c   :  { %v990_v24 = vadd.f32 %v969_v52, %v932_v7  ;;  %v4060_v33 = vrot.slane %v3546_v30, 1  ;;  %v4061_v13 = vrot.slane %v3546_v30, 3 }
 0x13d   :  { %v1857_v36 = vadd.f32 %v1833_v38, %v1799_v48  ;;  %v985_v49 = vadd.f32 %v4058_v47, %v927_v17  ;;  %v1195_v32 = vsel %vm133_vm0, %v1169_v19, 0.0  ;;  %v1688_v11 = vsel %vm362_vm2, %v4059_v20, %v1687_v1 }
 0x13e   :  { %v1000_v48 = vmul.f32 0.1, %v990_v24  ;;  %1196 = vadd.xlane.f32.xlu0 %v1195_v32  ;;  %v1745_v38 = vrot.slane %v1688_v11, 1  ;;  %v1783_v7 = vrot.slane %v1688_v11, 3  ;;  %v1815_v52 = vmul.f32 2.0, %v1688_v11 }
 0x13f   :  { %v1867_v14 = vmul.f32 0.1, %v1857_v36  ;;  %v995_v21 = vmul.f32 0.1, %v985_v49  ;;  %v321_v47 = vsel %vm146_vm3, %v293_v2, 0.0  ;;  %v4062_v49 = vrot.slane %v3554_v10, 4  ;;  %v3688_v20 = vpop.xlane.xlu0 %1098 }
 0x140   :  { %v1689_v51 = vrot.slane %v1000_v48, 6  ;;  %v1746_v17 = vsel %vm423_vm5, %v4060_v33, %v1745_v38  ;;  %v1784_v9 = vsel %vm462_vm6, %v4061_v13, %v1783_v7  ;;  %v1841_v61 = vrot.slane %v1815_v52, 4 }
 0x141   :  { %v2037_v54 = vand.u32 2147483647, %v1867_v14  ;;  %v1702_v18 = vrot.slane %v1000_v48, 5  ;;  %v1766_v19 = vsub.f32 %v1724_v50, %v1746_v17  ;;  %v1680_v24 = vrot.slane %v995_v21, 6 }
 0x142   :  { %v1842_v14 = vsel %vm406_vm7, %v4062_v49, %v1841_v61  ;;  %v1701_v32 = vrot.slane %v995_v21, 5  ;;  %v1170_v33 = vand.u32 2147483647, %v1000_v48  ;;  %v1690_v52 = vsel %vm362_vm2, %v1687_v1, %v1689_v51 }
 0x143   :  { %v2051_v36 = vsel %vm133_vm0, %v2037_v54, 0.0  ;;  %v1804_v30 = vadd.f32 %v1784_v9, %v1766_v19  ;;  %v1706_v13 = vrot.slane %v1000_v48, 4  ;;  %v1714_v5 = vsel %vm403_vm4, %v1690_v52, %v1702_v18  ;;  %v3698_v48 = vpop.xlane.xlu1 %1086 }
 0x144   :  { %2052 = vadd.xlane.f32.xlu1 %v2051_v36  ;;  %v4063_v50 = vrot.slane %v3606_v23, 6  ;;  %v1705_v17 = vrot.slane %v995_v21, 4  ;;  %v1725_v36 = vmul.f32 -2.0, %v1688_v11  ;;  %v1720_v1 = vmul.f32 -2.0, %v3627_v63 }
 0x145   :  { %v1862_v2 = vadd.f32 %v1842_v14, %v1804_v30  ;;  %v1716_v10 = vsel %vm406_vm7, %v1714_v5, %v1706_v13  ;;  %v1198_v23 = vsel %vm146_vm3, %v1170_v33, 0.0  ;;  %v1165_v14 = vand.u32 2147483647, %v995_v21 }
 0x146   :  { %v1681_v54 = vsel %vm362_vm2, %v4063_v50, %v1680_v24  ;;  %v1747_v55 = vrot.slane %v1716_v10, 1  ;;  %v1785_v9 = vrot.slane %v1716_v10, 3  ;;  %v1816_v19 = vmul.f32 2.0, %v1716_v10 }
 0x147   :  { %v1713_v49 = vsel %vm403_vm4, %v1681_v54, %v1701_v32  ;;  %v1872_v51 = vmul.f32 0.1, %v1862_v2  ;;  %v1726_v24 = vmul.f32 -2.0, %v1716_v10  ;;  %v4064_v21 = vrot.slane %v3627_v63, 1 }
 0x148   :  { %322 = vadd.xlane.f32.xlu1 %v321_v47  ;;  %v1715_v18 = vsel %vm406_vm7, %v1713_v49, %v1705_v17  ;;  %v1748_v5 = vsel %vm423_vm5, %v1745_v38, %v1747_v55  ;;  %v1786_v11 = vsel %vm462_vm6, %v1783_v7, %v1785_v9  ;;  %v1843_v32 = vrot.slane %v1816_v19, 4  ;;  %v3704_v47 = vpop.xlane.xlu0 %1969  ;;  %v1958_v19 = vpop.xlane.xlu1 %1957 }
 0x149   :  { %v2042_v30 = vand.u32 2147483647, %v1872_v51  ;;  %v1767_v52 = vsub.f32 %v1725_v36, %v1748_v5  ;;  %v1738_v13 = vrot.slane %v1715_v18, 1  ;;  %v1776_v50 = vrot.slane %v1715_v18, 3 }
 0x14a   :  { %v1844_v54 = vsel %vm406_vm7, %v1841_v61, %v1843_v32  ;;  %v1811_v2 = vmul.f32 2.0, %v1715_v18  ;;  %v1768_v33 = vsub.f32 %v1726_v24, %v1747_v55  ;;  %v4065_v7 = vrot.slane %v3627_v63, 3 }
 0x14b   :  { %v2066_v17 = vsel %vm133_vm0, %v2042_v30, 0.0  ;;  %v1805_v10 = vadd.f32 %v1786_v11, %v1767_v52  ;;  %v1739_v38 = vsel %vm423_vm5, %v4064_v21, %v1738_v13  ;;  %v1183_v36 = vsel %vm146_vm3, %v1165_v14, 0.0 }
 0x14c   :  { %1199 = vadd.xlane.f32.xlu1 %v1198_v23  ;;  %v1777_v49 = vsel %vm462_vm6, %v4065_v7, %v1776_v50  ;;  %2067 = vadd.xlane.f32.xlu0 %v2066_v17  ;;  %v1762_v23 = vsub.f32 %v1720_v1, %v1739_v38  ;;  %v1834_v61 = vrot.slane %v1811_v2, 4  ;;  %v1806_v5 = vadd.f32 %v1785_v9, %v1768_v33  ;;  %v1102_v24 = vpop.xlane.xlu0 %1101  ;;  %v1961_v2 = vpop.xlane.xlu1 %1960 }
 0x14d   :  { %v1863_v51 = vadd.f32 %v1844_v54, %v1805_v10  ;;  %v1721_v55 = vmul.f32 -2.0, %v1715_v18  ;;  %v4066_v52 = vrot.slane %v3633_v39, 4  ;;  %v228_v17 = vadd.f32 %v3328_v42, %v3337_v44 }
 0x14e   :  { %v1800_v11 = vadd.f32 %v1777_v49, %v1762_v23  ;;  %v1864_v41 = vadd.f32 %v1843_v32, %v1806_v5 }
 0x14f   :  { %v1873_v30 = vmul.f32 0.1, %v1863_v51  ;;  %v1835_v21 = vsel %vm406_vm7, %v4066_v52, %v1834_v61  ;;  %v1763_v63 = vsub.f32 %v1721_v55, %v1738_v13  ;;  %v229_v9 = vadd.f32 %v228_v17, %v3356_v43 }
 0x150   :  { %1184 = vadd.xlane.f32.xlu0 %v1183_v36  ;;  %v1858_v7 = vadd.f32 %v1835_v21, %v1800_v11  ;;  %v1874_v54 = vmul.f32 0.1, %v1864_v41  ;;  %v1973_v38 = vpop.xlane.xlu0 %1972  ;;  %v231_v41 = vsel %vm168_vm1, %v3370_v25, 0.0  ;;  %v1106_v11 = vsel %vm168_vm1, %v3698_v48, 0.0 }
 0x151   :  { %v2043_v14 = vand.u32 2147483647, %v1873_v30  ;;  %v1801_v1 = vadd.f32 %v1776_v50, %v1763_v63  ;;  %v230_v42 = vadd.f32 %v229_v9, %v3350_v45  ;;  %v3727_v50 = vpop.xlane.xlu1 %1012  ;;  %v1103_v45 = vadd.f32 %v3558_v12, %v3520_v28 }
 0x152   :  { %v1868_v33 = vmul.f32 0.1, %v1858_v7  ;;  %v2044_v10 = vand.u32 2147483647, %v1874_v54  ;;  %v242_v63 = vsel %vm168_vm1, %v3404_v40, 0.0  ;;  %v1980_v17 = vsel %vm168_vm1, %v1961_v2, 0.0 }
 0x153   :  { %v2069_v18 = vsel %vm133_vm0, %v2043_v14, 0.0  ;;  %v1859_v39 = vadd.f32 %v1834_v61, %v1801_v1  ;;  %v232_v23 = vadd.f32 %v231_v41, %v230_v42  ;;  %v239_v61 = vadd.f32 %v3394_v29, %v3364_v15 }
 0x154   :  { %2070 = vadd.xlane.f32.xlu1 %v2069_v18  ;;  %v2038_v32 = vand.u32 2147483647, %v1868_v33  ;;  %v2072_v13 = vsel %vm146_vm3, %v2044_v10, 0.0  ;;  %v1976_v51 = vpop.xlane.xlu0 %1975  ;;  %v1104_v30 = vadd.f32 %v1103_v45, %v3587_v3  ;;  %v1977_v15 = vadd.f32 %v3652_v37, %v3604_v34 }
 0x155   :  { %v1869_v49 = vmul.f32 0.1, %v1859_v39  ;;  %v3734_v5 = vpop.xlane.xlu1 %1027  ;;  %v233_v55 = vrot.slane %v232_v23, 4  ;;  %v240_v25 = vadd.f32 %v239_v61, %v3383_v46  ;;  %v1114_v46 = vadd.f32 %v3590_v60, %v3549_v4 }
 0x156   :  { %v2054_v44 = vsel %vm133_vm0, %v2038_v32, 0.0  ;;  %v1105_v21 = vadd.f32 %v1104_v30, %v3663_v22  ;;  %v1978_v3 = vadd.f32 %v1977_v15, %v3681_v31  ;;  %v177_v22 = vadd.f32 %v3285_v16, %v3232_v53 }
 0x157   :  { %2055 = vadd.xlane.f32.xlu0 %v2054_v44  ;;  %v2039_v43 = vand.u32 2147483647, %v1869_v49  ;;  %v234_v29 = vadd.f32 %v233_v55, %v232_v23  ;;  %v241_v28 = vadd.f32 %v240_v25, %v3419_v59  ;;  %v1115_v34 = vadd.f32 %v1114_v46, %v3610_v0 }
 0x158   :  { %2073 = vadd.xlane.f32.xlu1 %v2072_v13  ;;  %v3740_v52 = vpop.xlane.xlu0 %1015  ;;  %v1107_v12 = vadd.f32 %v1106_v11, %v1105_v21  ;;  %v1979_v37 = vadd.f32 %v1978_v3, %v1958_v19  ;;  %v1117_v54 = vsel %vm168_vm1, %v1102_v24, 0.0  ;;  %v1988_v31 = vadd.f32 %v3669_v58, %v3635_v26 }
 0x159   :  { %v2057_v36 = vsel %vm146_vm3, %v2039_v43, 0.0  ;;  %v3751_v48 = vpop.xlane.xlu1 %1018  ;;  %v235_v14 = vrot.slane %v234_v29, 2  ;;  %v243_v7 = vadd.f32 %v242_v63, %v241_v28  ;;  %v1116_v4 = vadd.f32 %v1115_v34, %v3688_v20 }
 0x15a   :  { %v1108_v40 = vrot.slane %v1107_v12, 4  ;;  %v1981_v60 = vadd.f32 %v1980_v17, %v1979_v37  ;;  %v178_v1 = vadd.f32 %v177_v22, %v3275_v8  ;;  %v1989_v9 = vadd.f32 %v1988_v31, %v3704_v47 }
 0x15b   :  { %2058 = vadd.xlane.f32.xlu0 %v2057_v36  ;;  %v1118_v2 = vadd.f32 %v1117_v54, %v1116_v4  ;;  %v236_v16 = vadd.f32 %v235_v14, %v234_v29  ;;  %v244_v0 = vrot.slane %v243_v7, 4  ;;  %v1991_v33 = vsel %vm168_vm1, %v1976_v51, 0.0 }
 0x15c   :  { %v3757_v59 = vpop.xlane.xlu0 %1030  ;;  %v1109_v19 = vadd.f32 %v1108_v40, %v1107_v12  ;;  %v1982_v18 = vrot.slane %v1981_v60, 4  ;;  %v1990_v20 = vadd.f32 %v1989_v9, %v1973_v38  ;;  %v180_v10 = vsel %vm168_vm1, %v3301_v57, 0.0 }
 0x15d   :  { %v3764_v53 = vpop.xlane.xlu1 %1886  ;;  %v179_v26 = vadd.f32 %v178_v1, %v3310_v62  ;;  %v1119_v8 = vrot.slane %v1118_v2, 4  ;;  %v237_v58 = vrot.slane %v236_v16, 1  ;;  %v245_v39 = vadd.f32 %v244_v0, %v243_v7 }
 0x15e   :  { %v1110_v32 = vrot.slane %v1109_v19, 2  ;;  %v1992_v13 = vadd.f32 %v1991_v33, %v1990_v20  ;;  %v1983_v49 = vadd.f32 %v1982_v18, %v1981_v60  ;;  %v171_v57 = vrot.slane %v3441_v56, 4 }
 0x15f   :  { %v181_v47 = vadd.f32 %v180_v10, %v179_v26  ;;  %v1120_v44 = vadd.f32 %v1119_v8, %v1118_v2  ;;  %v3775_v43 = vadd.f32 %v237_v58, %v236_v16  ;;  %v246_v36 = vrot.slane %v245_v39, 2 }
 0x160   :  { %v3768_v24 = vpop.xlane.xlu0 %1033  ;;  %v1111_v38 = vadd.f32 %v1110_v32, %v1109_v19  ;;  %v1993_v51 = vrot.slane %v1992_v13, 4  ;;  %v1984_v23 = vrot.slane %v1983_v49, 2  ;;  %v172_v15 = vadd.f32 %v171_v57, %v3441_v56 }
 0x161   :  { %v182_v62 = vrot.slane %v181_v47, 4  ;;  %v1121_v61 = vrot.slane %v1120_v44, 2  ;;  %2188 = vrsqrt.f32 %v3775_v43  ;;  %v247_v55 = vadd.f32 %v246_v36, %v245_v39 }
 0x162   :  { %v1112_v25 = vrot.slane %v1111_v38, 1  ;;  %v1994_v30 = vadd.f32 %v1993_v51, %v1992_v13  ;;  %v1985_v11 = vadd.f32 %v1984_v23, %v1983_v49  ;;  %v1041_v17 = vadd.f32 %v3740_v52, %v3727_v50 }
 0x163   :  { %v3773_v42 = vpop.xlane.xlu1 %1901  ;;  %v183_v29 = vadd.f32 %v182_v62, %v181_v47  ;;  %v1122_v28 = vadd.f32 %v1121_v61, %v1120_v44  ;;  %v248_v12 = vrot.slane %v247_v55, 1  ;;  %v173_v34 = vrot.slane %v172_v15, 2 }
 0x164   :  { %v3782_v63 = vadd.f32 %v1112_v25, %v1111_v38  ;;  %v1995_v46 = vrot.slane %v1994_v30, 2  ;;  %v1986_v3 = vrot.slane %v1985_v11, 1  ;;  %v1042_v7 = vadd.f32 %v1041_v17, %v3751_v48 }
 0x165   :  { %v184_v37 = vrot.slane %v183_v29, 2  ;;  %v1123_v14 = vrot.slane %v1122_v28, 1  ;;  %v3787_v54 = vadd.f32 %v248_v12, %v247_v55  ;;  %v174_v2 = vadd.f32 %v173_v34, %v172_v15 }
 0x166   :  { %2190 = vrsqrt.f32 %v3782_v63  ;;  %v1996_v56 = vadd.f32 %v1995_v46, %v1994_v30  ;;  %v3790_v4 = vadd.f32 %v1986_v3, %v1985_v11  ;;  %v1052_v9 = vadd.f32 %v3757_v59, %v3734_v5 }
 0x167   :  { %v1890_v41 = vpop.xlane.xlu0 %1889  ;;  %v185_v52 = vadd.f32 %v184_v37, %v183_v29  ;;  %v3793_v16 = vadd.f32 %v1123_v14, %v1122_v28  ;;  %2192 = vrsqrt.f32 %v3787_v54  ;;  %v175_v20 = vrot.slane %v174_v2, 1 }
 0x168   :  { %v1997_v48 = vrot.slane %v1996_v56, 1  ;;  %2194 = vrsqrt.f32 %v3790_v4  ;;  %v1053_v26 = vadd.f32 %v1052_v9, %v3768_v24  ;;  %vm266_vm8 = vcmp.eq.f32.partialorder %v3775_v43, inf }
 0x169   :  { %v186_v10 = vrot.slane %v185_v52, 1  ;;  %2196 = vrsqrt.f32 %v3793_v16  ;;  %v1915_v39 = vadd.f32 %v1890_v41, %v3764_v53  ;;  %v3807_v44 = vadd.f32 %v175_v20, %v174_v2 }
 0x16a   :  { %v3803_v58 = vadd.f32 %v1997_v48, %v1996_v56  ;;  %v269_v36 = vand.u32 2147483648, %v3775_v43  ;;  %vm268_vm9 = vcmp.eq.f32.partialorder %v3775_v43, 0.0  ;;  %vm273_vm10 = vcmp.eq.f32.partialorder %v3787_v54, inf }
 0x16b   :  { %v2189_v1 = vpop.eup %2188  ;;  %v3811_v51 = vadd.f32 %v186_v10, %v185_v52  ;;  %vm1141_vm11 = vcmp.eq.f32.partialorder %v3782_v63, inf  ;;  %vm275_vm12 = vcmp.eq.f32.partialorder %v3787_v54, 0.0  ;;  %vm1143_vm13 = vcmp.eq.f32.partialorder %v3782_v63, 0.0 }
 0x16c   :  { %v265_v19 = vmul.f32 %v2189_v1, %v3775_v43  ;;  %2198 = vrsqrt.f32 %v3803_v58  ;;  %v276_v52 = vand.u32 2147483648, %v3787_v54  ;;  %vm2015_vm14 = vcmp.eq.f32.partialorder %v3790_v4, inf }
 0x16d   :  { %2200 = vrsqrt.f32 %v3807_v44  ;;  %vm1148_vm15 = vcmp.eq.f32.partialorder %v3793_v16, inf  ;;  %v2018_v20 = vand.u32 2147483648, %v3790_v4  ;;  %vm2017_vm0 = vcmp.eq.f32.partialorder %v3790_v4, 0.0 }
 0x16e   :  { %v267_v13 = vsel %vm266_vm8, %v3775_v43, %v265_v19  ;;  %2202 = vrsqrt.f32 %v3811_v51  ;;  %vm1150_vm2 = vcmp.eq.f32.partialorder %v3793_v16, 0.0  ;;  %vm2022_vm3 = vcmp.eq.f32.partialorder %v3803_v58, inf }
 0x16f   :  { %v1022_v45 = vpop.xlane.xlu1 %1021  ;;  %v3814_v41 = vsel %vm268_vm9, %v269_v36, %v267_v13  ;;  %vm2024_vm4 = vcmp.eq.f32.partialorder %v3803_v58, 0.0  ;;  %vm252_vm7 = vcmp.eq.f32.partialorder %v3807_v44, inf  ;;  %vm254_vm8 = vcmp.eq.f32.partialorder %v3807_v44, 0.0 }
 0x170   :  { %v1043_v60 = vadd.f32 %v1042_v7, %v1022_v45  ;;  %v2191_v47 = vpop.eup %2190  ;;  %v278_v46 = vmax.f32 %v3814_v41, 1e-05 }
 0x171   :  { %v3779_v21 = vpop.xlane.xlu0 %1904  ;;  %v1140_v61 = vmul.f32 %v2191_v47, %v3782_v63  ;;  %v2193_v30 = vpop.eup %2192 }
 0x172   :  { %v2195_v15 = vpop.eup %2194  ;;  %v1926_v43 = vadd.f32 %v3779_v21, %v3773_v42  ;;  %v272_v42 = vmul.f32 %v2193_v30, %v3787_v54  ;;  %v1144_v21 = vand.u32 2147483648, %v3782_v63 }
 0x173   :  { %v2197_v17 = vpop.eup %2196  ;;  %v2014_v14 = vmul.f32 %v2195_v15, %v3790_v4 }
 0x174   :  { %v1147_v1 = vmul.f32 %v2197_v17, %v3793_v16 }
 0x175   :  { %v2016_v9 = vsel %vm2015_vm14, %v3790_v4, %v2014_v14  ;;  %vm2101_vm14 = vcmask 0  }
 0x176   :  { %v1037_v40 = vpop.xlane.xlu0 %1036  ;;  %v2199_v19 = vpop.eup %2198  ;;  %v2019_v47 = vsel %vm2017_vm0, %v2018_v20, %v2016_v9 }
 0x177   :  { %v1054_v49 = vadd.f32 %v1053_v26, %v1037_v40  ;;  %v2027_v4 = vmax.f32 %v2019_v47, 1e-05 }
 0x17d   :  { %v1893_v22 = vpop.xlane.xlu1 %1892 }
 0x17e   :  { %v1916_v38 = vadd.f32 %v1915_v39, %v1893_v22  ;;  %v1142_v22 = vsel %vm1141_vm11, %v3782_v63, %v1140_v61  ;;  %v274_v63 = vsel %vm273_vm10, %v3787_v54, %v272_v42  ;;  %v1149_v39 = vsel %vm1148_vm15, %v3793_v16, %v1147_v1 }
 0x17f   :  { %vm261_vm15 = vcmp.eq.f32.partialorder %v3811_v51, 0.0 }
 0x181   :  { %v1025_v31 = vpop.xlane.xlu1 %1024 }
 0x182   :  { %v1044_v50 = vsel %vm168_vm1, %v1025_v31, 0.0  ;;  %v1145_v31 = vsel %vm1143_vm13, %v1144_v21, %v1142_v22  ;;  %vm259_vm13 = vcmp.eq.f32.partialorder %v3811_v51, inf }
 0x183   :  { %v1045_v0 = vadd.f32 %v1044_v50, %v1043_v60 }
 0x184   :  { %v1908_v33 = vpop.xlane.xlu0 %1907 }
 0x185   :  { %v1046_v18 = vrot.slane %v1045_v0, 4  ;;  %v1927_v34 = vadd.f32 %v1926_v43, %v1908_v33  ;;  %v1153_v33 = vmax.f32 %v1145_v31, 1e-05 }
 0x187   :  { %v1047_v8 = vadd.f32 %v1046_v18, %v1045_v0 }
 0x188   :  { %v1896_v32 = vpop.xlane.xlu1 %1895  ;;  %v1040_v59 = vpop.xlane.xlu0 %1039 }
 0x189   :  { %v1048_v5 = vrot.slane %v1047_v8, 2  ;;  %v1055_v24 = vsel %vm168_vm1, %v1040_v59, 0.0  ;;  %v1917_v57 = vadd.f32 %v1916_v38, %v1896_v32  ;;  %v1151_v32 = vand.u32 2147483648, %v3793_v16 }
 0x18a   :  { %v1056_v53 = vadd.f32 %v1055_v24, %v1054_v49  ;;  %v277_v38 = vsel %vm275_vm12, %v276_v52, %v274_v63 }
 0x18b   :  { %v1049_v23 = vadd.f32 %v1048_v5, %v1047_v8  ;;  %v2201_v8 = vpop.eup %2200  ;;  %v2021_v5 = vmul.f32 %v2199_v19, %v3803_v58 }
 0x18c   :  { %v1899_v62 = vpop.xlane.xlu1 %1898  ;;  %v1057_v55 = vrot.slane %v1056_v53, 4  ;;  %v2203_v49 = vpop.eup %2202  ;;  %v251_v30 = vmul.f32 %v2201_v8, %v3807_v44 }
 0x18d   :  { %v1050_v45 = vrot.slane %v1049_v23, 1  ;;  %v1918_v25 = vsel %vm168_vm1, %v1899_v62, 0.0  ;;  %v2023_v41 = vsel %vm2022_vm3, %v3803_v58, %v2021_v5  ;;  %v279_v62 = vmax.f32 %v277_v38, 1e-05 }
 0x18e   :  { %v1919_v11 = vadd.f32 %v1918_v25, %v1917_v57  ;;  %v1058_v28 = vadd.f32 %v1057_v55, %v1056_v53  ;;  %v1911_v12 = vpop.xlane.xlu0 %1910  ;;  %v253_v17 = vsel %vm252_vm7, %v3807_v44, %v251_v30  ;;  %v258_v42 = vmul.f32 %v2203_v49, %v3811_v51 }
 0x18f   :  { %v3823_v29 = vadd.f32 %v1050_v45, %v1049_v23  ;;  %v1928_v56 = vadd.f32 %v1927_v34, %v1911_v12  ;;  %v1152_v23 = vsel %vm1150_vm2, %v1151_v32, %v1149_v39  ;;  %v2025_v45 = vand.u32 2147483648, %v3803_v58 }
 0x190   :  { %v1920_v3 = vrot.slane %v1919_v11, 4  ;;  %v1059_v37 = vrot.slane %v1058_v28, 2  ;;  %v1154_v16 = vmax.f32 %v1152_v23, 1e-05  ;;  %v260_v63 = vsel %vm259_vm13, %v3811_v51, %v258_v42 }
 0x191   :  { %2204 = vrsqrt.f32 %v3823_v29  ;;  %vm1127_vm5 = vcmp.eq.f32.partialorder %v3823_v29, inf  ;;  %v2026_v55 = vsel %vm2024_vm4, %v2025_v45, %v2023_v41  ;;  %v1130_v15 = vand.u32 2147483648, %v3823_v29  ;;  %v3868_v34 = vpop.xlane.xlu1 %1172 }
 0x192   :  { %v1921_v7 = vadd.f32 %v1920_v3, %v1919_v11  ;;  %v1060_v40 = vadd.f32 %v1059_v37, %v1058_v28  ;;  %vm1129_vm6 = vcmp.eq.f32.partialorder %v3823_v29, 0.0  ;;  %v2028_v28 = vmax.f32 %v2026_v55, 1e-05 }
 0x193   :  { %v1914_v60 = vpop.xlane.xlu0 %1913  ;;  %v255_v37 = vand.u32 2147483648, %v3807_v44 }
 0x194   :  { %v1922_v2 = vrot.slane %v1921_v7, 2  ;;  %v1929_v50 = vsel %vm168_vm1, %v1914_v60, 0.0  ;;  %v1061_v0 = vrot.slane %v1060_v40, 1 }
 0x195   :  { %v1930_v48 = vadd.f32 %v1929_v50, %v1928_v56  ;;  %v256_v14 = vsel %vm254_vm8, %v255_v37, %v253_v17 }
 0x196   :  { %v1923_v18 = vadd.f32 %v1922_v2, %v1921_v7  ;;  %v3845_v10 = vadd.f32 %v1061_v0, %v1060_v40  ;;  %v1188_v19 = vpop.xlane.xlu1 %1187 }
 0x197   :  { %v1931_v26 = vrot.slane %v1930_v48, 4 }
 0x198   :  { %v1924_v13 = vrot.slane %v1923_v18, 1  ;;  %2206 = vrsqrt.f32 %v3845_v10  ;;  %vm1134_vm9 = vcmp.eq.f32.partialorder %v3845_v10, inf  ;;  %v1137_v60 = vand.u32 2147483648, %v3845_v10 }
 0x199   :  { %v1932_v59 = vadd.f32 %v1931_v26, %v1930_v48  ;;  %2208 = vrcp.f32 %v278_v46  ;;  %vm1136_vm12 = vcmp.eq.f32.partialorder %v3845_v10, 0.0  ;;  %v1176_v39 = vpop.xlane.xlu0 %1175 }
 0x19a   :  { %v1925_v36 = vadd.f32 %v1924_v13, %v1923_v18  ;;  %2210 = vrcp.f32 %v1153_v33  ;;  %v262_v18 = vand.u32 2147483648, %v3811_v51 }
 0x19b   :  { %v2205_v24 = vpop.eup %2204  ;;  %v1933_v53 = vrot.slane %v1932_v59, 2 }
 0x19c   :  { %2212 = vrsqrt.f32 %v1925_v36  ;;  %v1126_v61 = vmul.f32 %v2205_v24, %v3823_v29  ;;  %vm2001_vm10 = vcmp.eq.f32.partialorder %v1925_v36, inf  ;;  %v2004_v40 = vand.u32 2147483648, %v1925_v36 }
 0x19d   :  { %v1934_v57 = vadd.f32 %v1933_v53, %v1932_v59  ;;  %2214 = vrcp.f32 %v2027_v4  ;;  %vm2003_vm11 = vcmp.eq.f32.partialorder %v1925_v36, 0.0  ;;  %v263_v26 = vsel %vm261_vm15, %v262_v18, %v260_v63 }
 0x19e   :  { %2216 = vrcp.f32 %v279_v62  ;;  %v1128_v11 = vsel %vm1127_vm5, %v3823_v29, %v1126_v61 }
 0x19f   :  { %v1935_v54 = vrot.slane %v1934_v57, 1  ;;  %2218 = vrcp.f32 %v1154_v16  ;;  %v1131_v12 = vsel %vm1129_vm6, %v1130_v15, %v1128_v11 }
 0x1a1   :  { %v1936_v25 = vadd.f32 %v1935_v54, %v1934_v57  ;;  %v317_v59 = vpop.xlane.xlu1 %316 }
 0x1a2   :  { %v2207_v43 = vpop.eup %2206 }
 0x1a3   :  { %2220 = vrsqrt.f32 %v1936_v25  ;;  %v2209_v58 = vpop.eup %2208  ;;  %v1133_v46 = vmul.f32 %v2207_v43, %v3845_v10  ;;  %vm2008_vm0 = vcmp.eq.f32.partialorder %v1936_v25, inf  ;;  %v2011_v8 = vand.u32 2147483648, %v1936_v25 }
 0x1a4   :  { %v2211_v3 = vpop.eup %2210  ;;  %2222 = vrcp.f32 %v2028_v28  ;;  %v281_v56 = vmul.f32 %v2209_v58, %v256_v14  ;;  %vm2010_vm2 = vcmp.eq.f32.partialorder %v1936_v25, 0.0 }
 0x1a5   :  { %v1156_v29 = vmul.f32 %v2211_v3, %v1131_v12  ;;  %v1135_v7 = vsel %vm1134_vm9, %v3845_v10, %v1133_v46 }
 0x1a6   :  { %v2213_v22 = vpop.eup %2212  ;;  %v1138_v50 = vsel %vm1136_vm12, %v1137_v60, %v1135_v7 }
 0x1a7   :  { %v2000_v21 = vmul.f32 %v2213_v22, %v1925_v36  ;;  %v2215_v1 = vpop.eup %2214  ;;  %v1159_v52 = vadd.f32 %v1156_v29, %v281_v56 }
 0x1a8   :  { %v2217_v2 = vpop.eup %2216 }
 0x1a9   :  { %v2002_v31 = vsel %vm2001_vm10, %v1925_v36, %v2000_v21  ;;  %v2219_v48 = vpop.eup %2218  ;;  %v283_v32 = vmul.f32 %v2217_v2, %v263_v26 }
 0x1aa   :  { %v2005_v44 = vsel %vm2003_vm11, %v2004_v40, %v2002_v31  ;;  %v1158_v20 = vmul.f32 %v2219_v48, %v1138_v50 }
 0x1ab   :  { %v2030_v0 = vmul.f32 %v2215_v1, %v2005_v44 }
 0x1ac   :  { %v1160_v47 = vadd.f32 %v1158_v20, %v283_v32 }
 0x1ad   :  { %v2221_v9 = vpop.eup %2220  ;;  %v2033_v33 = vadd.f32 %v2030_v0, %v1159_v52 }
 0x1ae   :  { %v2007_v10 = vmul.f32 %v2221_v9, %v1936_v25  ;;  %v2223_v49 = vpop.eup %2222 }
 0x1af   :  { %2102 = vst.msk [vmem:[#allocation7] sm:$0x1] %vm2101_vm14, %v2033_v33 }
 0x1b0   :  { %v2009_v13 = vsel %vm2008_vm0, %v1936_v25, %v2007_v10 }
 0x1b1   :  { %v2012_v5 = vsel %vm2010_vm2, %v2011_v8, %v2009_v13  ;;  %v1191_v51 = vpop.xlane.xlu0 %1190 }
 0x1b2   :  { %v2032_v36 = vmul.f32 %v2223_v49, %v2012_v5 }
 0x1b4   :  { %v2034_v38 = vadd.f32 %v2032_v36, %v1160_v47 }
 0x1b6   :  { %2103 = vst.msk [vmem:[#allocation7 + $0x1] sm:$0x1] %vm2101_vm14, %v2034_v38 }
 0x1b7   :  { %2280 = shalt.err (!%p2277_p6)
}
 0x1b8   :  { %s2281_s14 = scalar_lea.hbm %s3931_s2, 32 }
 0x1b9   :  { %p2282_p7 = scmp.ne.s32.totalorder %s3931_s2, %s2281_s14  ;;  %p2285_p8 = scmp.lt.u32.totalorder %s2281_s14, %s3931_s2 }
 0x1bb   :  { %p2287_p9 = pnand %p2285_p8, %p2282_p7 }
 0x1bd   :  { %2290 = shalt.err (!%p2287_p9)
}
 0x1be   :  { %s2326_s19 = smov 16   ;;  %s2327_s20 = smov 1   ;;  %v1194_v24 = vpop.xlane.xlu1 %1193  ;;  %v1179_v23 = vpop.xlane.xlu0 %1178  ;;  %v324_v45 = vadd.f32 %v3431_v6, %v3437_v35  ;;  %v4067_v54 = vld [vmem:[#allocation16_spill] sm:$0xff]  ;;  %v4068_v25 = vld [vmem:[#allocation18_spill] sm:$0xff]  ;;  %v1212_v15 = vadd.f32 %v1191_v51, %v1188_v19  ;;  %v4069_v3 = vld [vmem:[#allocation17_spill] sm:$0xff] }
 0x1bf   :  { %2117 = dma.vmem_to_hbm [thread:$0]  %s2112_s10, 32, %s3931_s2, [#allocation4], %s2326_s19, %s2326_s19, %s2327_s20   ;;  %v335_v55 = vadd.f32 %v4067_v54, %v3490_v27  ;;  %v4070_v29 = vld [vmem:[#allocation19_spill] sm:$0xff]  ;;  %v1201_v27 = vadd.f32 %v1176_v39, %v3868_v34 }
 0x1c0   :  { %v325_v30 = vadd.f32 %v324_v45, %v4068_v25  ;;  %v1213_v12 = vadd.f32 %v1212_v15, %v1194_v24  ;;  %v327_v6 = vsel %vm168_vm1, %v4070_v29, 0.0  ;;  %s2328_s2 = smov [#allocation8]  }
 0x1c1   :  { %v336_v11 = vadd.f32 %v335_v55, %v317_v59  ;;  %v1202_v40 = vadd.f32 %v1201_v27, %v1179_v23  ;;  %s2123_s23 = sshll.u32 %s2328_s2, 4  ;;  %s2124_s23 = int_to_ptr.vmem [resolvable:$true] %s2123_s23 }
 0x1c2   :  { %v2050_v53 = vpop.xlane.xlu1 %2049  ;;  %v2047_v4 = vpop.xlane.xlu0 %2046  ;;  %v326_v17 = vadd.f32 %v325_v30, %v4069_v3  ;;  %s2291_s24 = scalar_lea.vmem %s2124_s23, 32  ;;  %p2296_p11 = scmp.lt.s32.totalorder %s2124_s23, %s2124_s23 }
 0x1c3   :  { %v2075_v10 = vadd.f32 %v2050_v53, %v2047_v4  ;;  %p2292_p10 = scmp.ne.s32.totalorder %s2124_s23, %s2291_s24  ;;  %p2297_p12 = scmp.lt.s32.totalorder %s2291_s24, %s2291_s24 }
 0x1c4   :  { %v328_v7 = vadd.f32 %v327_v6, %v326_v17 }
 0x1c5   :  { %p2298_p13 = por %p2297_p12, %p2296_p11 }
 0x1c6   :  { %v2065_v41 = vpop.xlane.xlu1 %2064  ;;  %v2062_v57 = vpop.xlane.xlu0 %2061  ;;  %v329_v50 = vrot.slane %v328_v7, 4 }
 0x1c7   :  { %v2086_v48 = vadd.f32 %v2065_v41, %v2062_v57  ;;  %p2299_p0 = pnand %p2298_p13, %p2292_p10 }
 0x1c8   :  { %v330_v18 = vadd.f32 %v329_v50, %v328_v7 }
 0x1ca   :  { %v1182_v62 = vpop.xlane.xlu1 %1181  ;;  %v320_v61 = vpop.xlane.xlu0 %319  ;;  %v331_v5 = vrot.slane %v330_v18, 2 }
 0x1cb   :  { %v337_v46 = vadd.f32 %v336_v11, %v320_v61  ;;  %v1203_v31 = vadd.f32 %v1202_v40, %v1182_v62 }
 0x1cc   :  { %v332_v62 = vadd.f32 %v331_v5, %v330_v18 }
 0x1ce   :  { %v1197_v43 = vpop.xlane.xlu0 %1196  ;;  %v333_v30 = vrot.slane %v332_v62, 1 }
 0x1cf   :  { %v1214_v22 = vadd.f32 %v1213_v12, %v1197_v43 }
 0x1d1   :  { %v2053_v16 = vpop.xlane.xlu1 %2052 }
 0x1d2   :  { %v2076_v59 = vadd.f32 %v2075_v10, %v2053_v16 }
 0x1d5   :  { %v323_v28 = vpop.xlane.xlu1 %322 }
 0x1d6   :  { %v338_v58 = vsel %vm168_vm1, %v323_v28, 0.0 }
 0x1d7   :  { %v339_v37 = vadd.f32 %v338_v58, %v337_v46  ;;  %v334_v46 = vadd.f32 %v333_v30, %v332_v62 }
 0x1d9   :  { %v1200_v42 = vpop.xlane.xlu1 %1199  ;;  %v2068_v21 = vpop.xlane.xlu0 %2067  ;;  %v340_v56 = vrot.slane %v339_v37, 4 }
 0x1da   :  { %v1215_v35 = vsel %vm168_vm1, %v1200_v42, 0.0  ;;  %v2087_v33 = vadd.f32 %v2086_v48, %v2068_v21 }
 0x1db   :  { %v1216_v14 = vadd.f32 %v1215_v35, %v1214_v22  ;;  %v341_v52 = vadd.f32 %v340_v56, %v339_v37  ;;  %v346_v35 = vmul.f32 0.00046620046, %v334_v46 }
 0x1dd   :  { %v1217_v60 = vrot.slane %v1216_v14, 4  ;;  %v1185_v44 = vpop.xlane.xlu0 %1184  ;;  %v342_v34 = vrot.slane %v341_v52, 2 }
 0x1de   :  { %v1204_v2 = vsel %vm168_vm1, %v1185_v44, 0.0 }
 0x1df   :  { %v1218_v1 = vadd.f32 %v1217_v60, %v1216_v14  ;;  %v1205_v0 = vadd.f32 %v1204_v2, %v1203_v31  ;;  %v343_v47 = vadd.f32 %v342_v34, %v341_v52 }
 0x1e1   :  { %v1219_v19 = vrot.slane %v1218_v1, 2  ;;  %v1206_v63 = vrot.slane %v1205_v0, 4  ;;  %v2071_v9 = vpop.xlane.xlu1 %2070  ;;  %v344_v53 = vrot.slane %v343_v47, 1 }
 0x1e2   :  { %v2088_v39 = vadd.f32 %v2087_v33, %v2071_v9 }
 0x1e3   :  { %v1207_v20 = vadd.f32 %v1206_v63, %v1205_v0  ;;  %v1220_v26 = vadd.f32 %v1219_v19, %v1218_v1  ;;  %v345_v11 = vadd.f32 %v344_v53, %v343_v47 }
 0x1e4   :  { %v2056_v32 = vpop.xlane.xlu0 %2055 }
 0x1e5   :  { %v1208_v8 = vrot.slane %v1207_v20, 2  ;;  %v2074_v13 = vpop.xlane.xlu1 %2073  ;;  %v1221_v38 = vrot.slane %v1220_v26, 1  ;;  %v2077_v24 = vadd.f32 %v2076_v59, %v2056_v32  ;;  %v347_v3 = vmul.f32 0.00046620046, %v345_v11 }
 0x1e6   :  { %v2089_v49 = vsel %vm168_vm1, %v2074_v13, 0.0 }
 0x1e7   :  { %v2090_v36 = vadd.f32 %v2089_v49, %v2088_v39  ;;  %v1209_v51 = vadd.f32 %v1208_v8, %v1207_v20  ;;  %v1222_v45 = vadd.f32 %v1221_v38, %v1220_v26 }
 0x1e8   :  { %v2059_v41 = vpop.xlane.xlu0 %2058 }
 0x1e9   :  { %v2091_v23 = vrot.slane %v2090_v36, 4  ;;  %v2078_v57 = vsel %vm168_vm1, %v2059_v41, 0.0  ;;  %v1210_v54 = vrot.slane %v1209_v51, 1  ;;  %v1224_v43 = vmul.f32 0.00046620046, %v1222_v45 }
 0x1ea   :  { %v2079_v61 = vadd.f32 %v2078_v57, %v2077_v24 }
 0x1eb   :  { %v2092_v4 = vadd.f32 %v2091_v23, %v2090_v36  ;;  %v1211_v28 = vadd.f32 %v1210_v54, %v1209_v51  ;;  %v1226_v37 = vadd.f32 %v1224_v43, %v347_v3 }
 0x1ec   :  { %v2080_v25 = vrot.slane %v2079_v61, 4 }
 0x1ed   :  { %v2093_v55 = vrot.slane %v2092_v4, 2  ;;  %v1223_v42 = vmul.f32 0.00046620046, %v1211_v28 }
 0x1ee   :  { %v2081_v15 = vadd.f32 %v2080_v25, %v2079_v61 }
 0x1ef   :  { %v2094_v16 = vadd.f32 %v2093_v55, %v2092_v4  ;;  %v1225_v14 = vadd.f32 %v1223_v42, %v346_v35 }
 0x1f0   :  { %v2082_v12 = vrot.slane %v2081_v15, 2 }
 0x1f1   :  { %v2095_v58 = vrot.slane %v2094_v16, 1 }
 0x1f2   :  { %v2083_v22 = vadd.f32 %v2082_v12, %v2081_v15 }
 0x1f3   :  { %v2096_v17 = vadd.f32 %v2095_v58, %v2094_v16 }
 0x1f4   :  { %v2084_v6 = vrot.slane %v2083_v22, 1 }
 0x1f5   :  { %v2098_v29 = vmul.f32 0.00046620046, %v2096_v17 }
 0x1f6   :  { %v2085_v21 = vadd.f32 %v2084_v6, %v2083_v22 }
 0x1f7   :  { %v2100_v27 = vadd.f32 %v2098_v29, %v1226_v37 }
 0x1f8   :  { %v2097_v7 = vmul.f32 0.00046620046, %v2085_v21 }
 0x1f9   :  { %2105 = vst.msk [vmem:[#allocation8 + $0x1] sm:$0x1] %vm2101_vm14, %v2100_v27 }
 0x1fa   :  { %v2099_v40 = vadd.f32 %v2097_v7, %v1225_v14 }
 0x1fc   :  { %2104 = vst.msk [vmem:[#allocation8] sm:$0x1] %vm2101_vm14, %v2099_v40 }
 0x1fd   :  { %2302 = shalt.err (!%p2299_p0)
}
 0x1fe   :  { %s2303_s27 = scalar_lea.hbm %s3932_s3, 32 }
 0x1ff   :  { %p2304_p1 = scmp.ne.s32.totalorder %s3932_s3, %s2303_s27  ;;  %p2307_p2 = scmp.lt.u32.totalorder %s2303_s27, %s3932_s3 }
 0x201   :  { %p2309_p3 = pnand %p2307_p2, %p2304_p1 }
 0x203   :  { %2312 = shalt.err (!%p2309_p3)
}
 0x204   :  { %2129 = dma.vmem_to_hbm [thread:$0]  %s2124_s23, 32, %s3932_s3, [#allocation9], %s2326_s19, %s2326_s19, %s2327_s20  }
 0x205   :  { %2317 = dma.done.wait [#allocation4], 32  }
 0x206   :  { %2318 = vsyncadd [#allocation4], 4294967264 }
 0x207   :  { %2319 = dma.done.wait [#allocation9], 32  }
 0x208   :  { %2320 = vsyncadd [#allocation9], 4294967264 }
 0x209   :  { %2136 = vsyncpa [#allocation3], 1 }
 0x20a   :  { %2137 = vsyncpa [#allocation6], 1 }
 0x20b   :  { %2138 = vsyncpa [#allocation4], 1 }
 0x20c   :  { %2139 = vsyncpa [#allocation9], 1 }

</bundles_post_ra>
